<compile_context>
chip_gen: v7x
topology: tpu7x:2x2x1
jax: 0.10.0
libtpu: 0.0.40
codegen_flags: <defaults>
</compile_context>

<pallas_src>
import math
from functools import partial

import jax
import jax.numpy as jnp
from jax.experimental import pallas as pl
from jax.experimental.pallas import tpu as pltpu

BN_EPS = 1e-5
LN_EPS = 1e-5
LEAKY_SLOPE = 0.2
COMPUTE_DTYPE = jnp.bfloat16          # MXU operand dtype (accumulation is f32)


# ----------------------------------------------------------------------------
# Dense layer kernel: finalize the previous layer (BN fold + LeakyReLU) and
# compute this layer's pre-BN output z + batch statistics, tiled over P.
# ----------------------------------------------------------------------------
def _make_dense_layer_kernel(n_hbm_acts, has_prev, emit_y, tiles_per_split,
                             tile_p, p_real, padded, compute_dtype):
    n_chunks = n_hbm_acts + (1 if has_prev else 0)

    def kernel(*refs):
        i = 0
        act_refs = refs[i:i + n_hbm_acts]; i += n_hbm_acts
        if has_prev:
            zp_ref, sc_ref, sh_ref = refs[i:i + 3]; i += 3
        w_refs = refs[i:i + n_chunks]; i += n_chunks
        if emit_y:
            y_out = refs[i]; i += 1
        z_out, sum_out, sq_out = refs[i:i + 3]

        p = pl.program_id(1)                              # P-tile within split

        acts = [r[...] for r in act_refs]                 # bf16 (C_k, tile_p)
        if has_prev:
            # finalize layer l-1: z*scale + shift, then LeakyReLU(0.2)
            yp = zp_ref[...] * sc_ref[...] + sh_ref[...]
            yp = jnp.where(yp >= 0.0, yp, LEAKY_SLOPE * yp)
            if padded:
                # zero padded columns so they contribute 0 to later-layer stats
                s = pl.program_id(0)
                gtile = s * tiles_per_split + p
                col = gtile * tile_p + jax.lax.broadcasted_iota(
                    jnp.int32, yp.shape, 1)
                yp = jnp.where(col < p_real, yp, 0.0)
            yp = yp.astype(compute_dtype)
            if emit_y:
                y_out[...] = yp
            acts.append(yp)

        # z_l = sum_k W_{l,k} @ act_k  (pre-split weights; bf16 MXU, f32 acc)
        z = None
        for k in range(len(acts)):
            part = jnp.dot(w_refs[k][...], acts[k],
                           preferred_element_type=jnp.float32)
            z = part if z is None else z + part
        z_out[...] = z

        # per-channel batch statistics (resident accumulator output blocks)
        @pl.when(p == 0)
        def _():
            sum_out[...] = jnp.zeros_like(sum_out)
            sq_out[...] = jnp.zeros_like(sq_out)
        sum_out[...] += jnp.sum(z, axis=1, keepdims=True)[None]
        sq_out[...] += jnp.sum(z * z, axis=1, keepdims=True)[None]

    return kernel


def _dense_layer_call(acts, z_prev, scale_prev, shift_prev, w_chunks, *,
                      cout, tile_p, p_pad, p_real, n_splits, emit_y):
    has_prev = z_prev is not None
    assert (not emit_y) or has_prev
    n_hbm = len(acts)
    n_tiles = p_pad // tile_p
    assert n_tiles % n_splits == 0
    tps = n_tiles // n_splits
    padded = (p_pad != p_real)

    def tile_map(sps):
        return lambda s, p: (0, s * sps + p)

    const_map = lambda s, p: (0, 0)

    inputs, in_specs = [], []
    for a in acts:
        inputs.append(a)
        in_specs.append(pl.BlockSpec((a.shape[0], tile_p), tile_map(tps)))
    if has_prev:
        cprev = z_prev.shape[0]
        inputs += [z_prev, scale_prev, shift_prev]
        in_specs += [pl.BlockSpec((cprev, tile_p), tile_map(tps)),
                     pl.BlockSpec((cprev, 1), const_map),
                     pl.BlockSpec((cprev, 1), const_map)]
    for w in w_chunks:
        inputs.append(w)
        in_specs.append(pl.BlockSpec(w.shape, const_map))

    out_shapes, out_specs = [], []
    if emit_y:
        out_shapes.append(jax.ShapeDtypeStruct((cprev, p_pad), COMPUTE_DTYPE))
        out_specs.append(pl.BlockSpec((cprev, tile_p), tile_map(tps)))
    out_shapes.append(jax.ShapeDtypeStruct((cout, p_pad), jnp.float32))
    out_specs.append(pl.BlockSpec((cout, tile_p), tile_map(tps)))
    for _ in range(2):                                   # sum(z), sum(z^2)
        out_shapes.append(jax.ShapeDtypeStruct((n_splits, cout, 1), jnp.float32))
        out_specs.append(pl.BlockSpec((1, cout, 1), lambda s, p: (s, 0, 0)))

    kernel = _make_dense_layer_kernel(n_hbm, has_prev, emit_y, tps, tile_p,
                                      p_real, padded, COMPUTE_DTYPE)
    return pl.pallas_call(
        kernel,
        out_shape=tuple(out_shapes),
        grid_spec=pltpu.PrefetchScalarGridSpec(
            num_scalar_prefetch=0,
            grid=(n_splits, tps),
            in_specs=in_specs,
            out_specs=out_specs,
        ),
        compiler_params=pltpu.CompilerParams(
            # split axis = independent per-core work (v7x megacore);
            # P-tile axis carries the stats accumulators -> sequential.
            dimension_semantics=("parallel", "arbitrary"),
        ),
    )(*inputs)


# ----------------------------------------------------------------------------
# GC_attn kernel (pool='att', fusions=['channel_add','channel_mul']) with the
# last dense layer's BN + LeakyReLU fused in (consumes z_last directly).
# ----------------------------------------------------------------------------
def _make_gc_kernel(c):
    def kernel(z_ref, sc_ref, sh_ref,
               wm_ref, bm_ref, w1_ref, b1_ref,
               lnwm_ref, lnbm_ref, lnwa_ref, lnba_ref,
               w2m_ref, b2m_ref, w2a_ref, b2a_ref, o_ref):
        # fused finalize of the last dense layer
        y = z_ref[...] * sc_ref[...] + sh_ref[...]
        y = jnp.where(y >= 0.0, y, LEAKY_SLOPE * y)            # (C, N) f32

        # attention spatial pooling: logits is a cheap C=16 sublane reduce;
        # the deep contraction over N (context) runs on the MXU.
        logits = (jnp.sum(y * wm_ref[...], axis=0, keepdims=True)
                  + bm_ref[...])                               # (1, N)
        logits = logits - jnp.max(logits, axis=1, keepdims=True)
        e = jnp.exp(logits)
        attn = e / jnp.sum(e, axis=1, keepdims=True)           # (1, N)
        context = jax.lax.dot_general(                         # (C, 1), K = N
            y, attn, (((1,), (1,)), ((), ())),
            preferred_element_type=jnp.float32)

        # both channel branches' first convs stacked into one (2C, C) matmul
        h = (jnp.dot(w1_ref[...], context,
                     preferred_element_type=jnp.float32)
             + b1_ref[...])                                    # (2C, 1)
        hm, ha = h[:c], h[c:]

        def layer_norm(v, w, b):                               # LayerNorm([C,1])
            mu = jnp.mean(v, axis=0, keepdims=True)
            var = jnp.mean((v - mu) * (v - mu), axis=0, keepdims=True)
            return (v - mu) * jax.lax.rsqrt(var + LN_EPS) * w + b

        hm = jnp.maximum(layer_norm(hm, lnwm_ref[...], lnbm_ref[...]), 0.0)
        ha = jnp.maximum(layer_norm(ha, lnwa_ref[...], lnba_ref[...]), 0.0)
        mul_term = jax.nn.sigmoid(
            jnp.dot(w2m_ref[...], hm, preferred_element_type=jnp.float32)
            + b2m_ref[...])                                    # (C, 1)
        add_term = (jnp.dot(w2a_ref[...], ha,
                            preferred_element_type=jnp.float32)
                    + b2a_ref[...])                            # (C, 1)

        o_ref[...] = (y * mul_term + add_term).astype(o_ref.dtype)
    return kernel


def gc_attn_forward_cp(z_last, scale, shift, gc_params, *, batch, n, out_dtype):
    """GC_attn on channel-major activations; z_last: (C, P_pad), P = batch*n
    batch-major.  The dense module's final BN+LeakyReLU is applied in-kernel."""
    c = z_last.shape[0]
    if n % 128 != 0 and not (batch == 1 and z_last.shape[1] == n):
        # TODO(synk): tile GC_attn over N (two-pass / online softmax) for spatial
        # sizes that are not lane-dense multiples of 128 or do not fit VMEM.
        raise ValueError(f"H*W = {n} must be a multiple of 128 for the "
                         f"lane-dense GC_attn block layout.")
    params = list(gc_params)
    const_map = lambda b: (0, 0)
    in_specs = [pl.BlockSpec((c, n), lambda b: (0, b)),
                pl.BlockSpec((c, 1), const_map),
                pl.BlockSpec((c, 1), const_map)]
    in_specs += [pl.BlockSpec(p.shape, const_map) for p in params]
    return pl.pallas_call(
        _make_gc_kernel(c),
        out_shape=jax.ShapeDtypeStruct((c, batch * n), out_dtype),
        grid_spec=pltpu.PrefetchScalarGridSpec(
            num_scalar_prefetch=0,
            grid=(batch,),
            in_specs=in_specs,
            out_specs=pl.BlockSpec((c, n), lambda b: (0, b)),
        ),
        compiler_params=pltpu.CompilerParams(
            dimension_semantics=("parallel",),
        ),
    )(z_last, scale, shift, *params)


# ----------------------------------------------------------------------------
# Top-level forward
# ----------------------------------------------------------------------------
def _choose_tile(p, cap):
    """Lane-dense tile: multiple of 128, <= cap; pad P up rather than shrink."""
    cap = max(128, (cap // 128) * 128)
    if p <= cap:
        tile = ((p + 127) // 128) * 128
    else:
        tile = cap
    p_pad = ((p + tile - 1) // tile) * tile
    return tile, p_pad


@partial(jax.jit, static_argnames=("tile_p_cap",))
def dense_attn_2d_forward(x_nchw, dense_params, gc_params, *, tile_p_cap=1024):
    """Dense_Attn_2D.forward: x (NCHW) -> DenseModule2D -> GC_attn -> (NCHW)."""
    B, c0, H, W = x_nchw.shape
    n = H * W
    p_real = B * n
    couts = [w.shape[0] for (w, _, _) in dense_params]
    n_layers = len(dense_params)

    tile_p, p_pad = _choose_tile(p_real, tile_p_cap)
    n_tiles = p_pad // tile_p
    n_splits = 2 if (n_tiles >= 2 and n_tiles % 2 == 0) else 1

    # channel-major, lane-dense, batch-major-P layout: (C, P)
    x_cp = jnp.transpose(x_nchw, (1, 0, 2, 3)).reshape(c0, p_real)
    if p_pad > p_real:
        x_cp = jnp.pad(x_cp, ((0, 0), (0, p_pad - p_real)))
    x_cp = x_cp.astype(COMPUTE_DTYPE)

    acts = [x_cp]                 # finalized activations persisted in HBM (bf16)
    z_prev = scale_prev = shift_prev = None

    for l in range(n_layers):
        wT, gamma, beta = dense_params[l]
        cout = couts[l]
        blocks = [c0] + couts[:l]          # widths of [x, y_0, ..., y_{l-1}]
        assert wT.shape == (cout, sum(blocks)), (wT.shape, cout, blocks)
        w_chunks, off = [], 0
        for cb in blocks:                  # pre-split weight -> no concat ever
            w_chunks.append(wT[:, off:off + cb].astype(COMPUTE_DTYPE))
            off += cb

        emit_y = (l >= 1) and (l < n_layers - 1)   # does a later layer need y_{l-1}?
        outs = _dense_layer_call(
            acts, z_prev, scale_prev, shift_prev, w_chunks,
            cout=cout, tile_p=tile_p, p_pad=p_pad, p_real=p_real,
            n_splits=n_splits, emit_y=emit_y)
        if emit_y:
            y_prev, z_l, ssum, ssq = outs
            acts.append(y_prev)
        else:
            z_l, ssum, ssq = outs

        # fold training-mode BatchNorm (biased batch var) into scale/shift
        ssum = jnp.sum(ssum, axis=0)                 # combine per-core partials
        ssq = jnp.sum(ssq, axis=0)
        mean = ssum / p_real
        var = jnp.maximum(ssq / p_real - mean * mean, 0.0)
        scale = (gamma.reshape(cout, 1).astype(jnp.float32)
                 * jax.lax.rsqrt(var + BN_EPS))
        shift = beta.reshape(cout, 1).astype(jnp.float32) - mean * scale

        z_prev, scale_prev, shift_prev = z_l, scale, shift

    # GC_attn consumes the same (C, B*N) layout; the last BN+LeakyReLU is fused.
    out_cp = gc_attn_forward_cp(z_prev, scale_prev, shift_prev, gc_params,
                                batch=B, n=n, out_dtype=x_nchw.dtype)
    return jnp.transpose(out_cp.reshape(couts[-1], B, H, W), (1, 0, 2, 3))


# ----------------------------------------------------------------------------
# Parameter init (mirrors PyTorch defaults)
# ----------------------------------------------------------------------------
def init_dense_params(key, in_dim, mlps, dtype=jnp.float32):
    """Conv2d 1x1 weight ~ U(-1/sqrt(Cin), 1/sqrt(Cin)) stored as (Cout, Cin);
    BatchNorm2d weight=1, bias=0.  The conv bias is omitted: with training-mode
    BatchNorm a per-channel bias cancels exactly in (z - mean(z))."""
    params = []
    cin = in_dim
    for i in range(1, len(mlps)):
        cout = mlps[i]
        key, kw = jax.random.split(key)
        bound = 1.0 / math.sqrt(cin)
        wT = jax.random.uniform(kw, (cout, cin), dtype, -bound, bound)
        gamma = jnp.ones((cout, 1), dtype)
        beta = jnp.zeros((cout, 1), dtype)
        params.append((wT, gamma, beta))
        cin += cout
    return params, key


def init_gc_params(key, c, dtype=jnp.float32):
    """GC_attn params (Conv1d / LayerNorm PyTorch defaults).  The two branches'
    first Conv1d weights are pre-stacked into one (2C, C) matrix."""
    def conv1d(key, cin, cout):
        key, kw, kb = jax.random.split(key, 3)
        bound = 1.0 / math.sqrt(cin)
        w = jax.random.uniform(kw, (cout, cin), dtype, -bound, bound)
        b = jax.random.uniform(kb, (cout, 1), dtype, -bound, bound)
        return key, w, b

    key, wm, bm = conv1d(key, c, 1)            # conv_mask: Conv1d(C -> 1)
    wm = wm.reshape(c, 1)                      # stored as a (C, 1) column
    key, w1m, b1m = conv1d(key, c, c)          # channel_mul_conv[0]
    key, w2m, b2m = conv1d(key, c, c)          # channel_mul_conv[3]
    key, w1a, b1a = conv1d(key, c, c)          # channel_add_conv[0]
    key, w2a, b2a = conv1d(key, c, c)          # channel_add_conv[3]
    lnwm = jnp.ones((c, 1), dtype); lnbm = jnp.zeros((c, 1), dtype)
    lnwa = jnp.ones((c, 1), dtype); lnba = jnp.zeros((c, 1), dtype)
    w1s = jnp.concatenate([w1m, w1a], axis=0)  # (2C, C) stacked first convs
    b1s = jnp.concatenate([b1m, b1a], axis=0)  # (2C, 1)
    return (wm, bm, w1s, b1s, lnwm, lnbm, lnwa, lnba,
            w2m, b2m, w2a, b2a), key


# ----------------------------------------------------------------------------
# Pure-JAX f32 reference (for correctness check only)
# ----------------------------------------------------------------------------
def reference_forward(x_nchw, dense_params, gc_params):
    B, _, H, W = x_nchw.shape
    cur = x_nchw.astype(jnp.float32)
    y = None
    for (wT, gamma, beta) in dense_params:
        z = jnp.einsum('oc,bchw->bohw', wT.astype(jnp.float32), cur)
        mean = jnp.mean(z, axis=(0, 2, 3), keepdims=True)
        var = jnp.mean((z - mean) ** 2, axis=(0, 2, 3), keepdims=True)
        zn = (z - mean) * jax.lax.rsqrt(var + BN_EPS)
        zn = zn * gamma.reshape(1, -1, 1, 1) + beta.reshape(1, -1, 1, 1)
        y = jnp.where(zn >= 0.0, zn, LEAKY_SLOPE * zn)
        cur = jnp.concatenate([cur, y], axis=1)

    (wm, bm, w1s, b1s, lnwm, lnbm, lnwa, lnba, w2m, b2m, w2a, b2a) = gc_params
    C = y.shape[1]
    n = H * W
    flat = y.reshape(B, C, n)
    logits = jnp.einsum('co,bcn->bon', wm, flat) + bm.reshape(1, 1, 1)
    attn = jax.nn.softmax(logits, axis=2)                    # (B, 1, N)
    context = jnp.einsum('bcn,bon->bco', flat, attn)         # (B, C, 1)
    h = jnp.einsum('oc,bcx->box', w1s, context) + b1s.reshape(1, -1, 1)
    hm, ha = h[:, :C], h[:, C:]

    def layer_norm(v, w, b):
        mu = jnp.mean(v, axis=(1, 2), keepdims=True)
        var = jnp.mean((v - mu) ** 2, axis=(1, 2), keepdims=True)
        return ((v - mu) * jax.lax.rsqrt(var + LN_EPS) * w.reshape(1, -1, 1)
                + b.reshape(1, -1, 1))

    hm = jnp.maximum(layer_norm(hm, lnwm, lnbm), 0.0)
    ha = jnp.maximum(layer_norm(ha, lnwa, lnba), 0.0)
    mul = jax.nn.sigmoid(jnp.einsum('oc,bcx->box', w2m, hm)
                         + b2m.reshape(1, -1, 1))
    add = jnp.einsum('oc,bcx->box', w2a, ha) + b2a.reshape(1, -1, 1)
    out = flat * mul + add
    return out.reshape(B, C, H, W)


if __name__ == "__main__":
    # Shapes consistent with the module: in_dim=32, mlps=[32, 32, 16]
    #  -> dense layers Conv2d(32->32), Conv2d(64->16); GC_attn on 16 channels.
    in_dim = 32
    mlps = [32, 32, 16]
    B, H, W = 2, 16, 16            # P = B*H*W = 512

    key = jax.random.PRNGKey(0)
    key, kx = jax.random.split(key)
    x = jax.random.normal(kx, (B, in_dim, H, W), dtype=jnp.float32)
    dense_params, key = init_dense_params(key, in_dim, mlps)
    gc_params, key = init_gc_params(key, mlps[-1])

    # tile_p_cap=128 only to exercise the multi-tile + 2-way parallel-split path
    # at this toy size; the production default is tile_p_cap=1024.
    out = dense_attn_2d_forward(x, dense_params, gc_params, tile_p_cap=128)
    jax.block_until_ready(out)

    assert out.shape == (B, mlps[-1], H, W), out.shape
    assert bool(jnp.all(jnp.isfinite(out))), "non-finite output"

    ref = reference_forward(x, dense_params, gc_params)
    err = float(jnp.max(jnp.abs(out.astype(jnp.float32) - ref)))
    assert err < 1e-1, f"kernel/reference mismatch: max abs err = {err}"
    print("KERNEL_OK")
</pallas_src>

<mosaic_0001>
module attributes {stable_mosaic.version = 11 : i64} {
  func.func @kernel(%arg0: i32, %arg1: i32, %arg2: memref<32x128xbf16, #tpu.memory_space<vmem>>, %arg3: memref<32x32xbf16, #tpu.memory_space<vmem>>, %arg4: memref<32x128xf32, #tpu.memory_space<vmem>>, %arg5: memref<1x32x1xf32, #tpu.memory_space<vmem>>, %arg6: memref<1x32x1xf32, #tpu.memory_space<vmem>>) attributes {dimension_semantics = [#tpu.dimension_semantics<parallel>, #tpu.dimension_semantics<arbitrary>], iteration_bounds = array<i64: 2, 2>, scalar_prefetch = 0 : i64, scratch_operands = 0 : i64, tpu.core_type = #tpu.core_type<tc>, window_params = [{transform_indices = @transform_0, window_bounds = array<i64: 32, 128>}, {pipeline_mode = #tpu.pipeline_mode<synchronous>, transform_indices = @transform_1, window_bounds = array<i64: 32, 32>}, {transform_indices = @transform_2, window_bounds = array<i64: 32, 128>}, {transform_indices = @transform_3, window_bounds = array<i64: 1, 32, 1>}, {transform_indices = @transform_4, window_bounds = array<i64: 1, 32, 1>}]} {
    %c0 = arith.constant 0 : index
    %c0_0 = arith.constant 0 : index
    %0 = vector.load %arg2[%c0, %c0_0] : memref<32x128xbf16, #tpu.memory_space<vmem>>, vector<32x128xbf16>
    %c0_1 = arith.constant 0 : index
    %c0_2 = arith.constant 0 : index
    %1 = vector.load %arg3[%c0_1, %c0_2] : memref<32x32xbf16, #tpu.memory_space<vmem>>, vector<32x32xbf16>
    %cst = arith.constant dense<0.000000e+00> : vector<32x128xf32>
    %2 = tpu.matmul %1, %0, %cst {dimension_numbers = #tpu.dot_dimension_numbers<[1], [0], [0], [1], [0, 0, 1, 1], [], []>} : vector<32x32xbf16>, vector<32x128xbf16>, vector<32x128xf32> -> vector<32x128xf32>
    %c0_3 = arith.constant 0 : index
    %c0_4 = arith.constant 0 : index
    %3 = vector.load %arg4[%c0_3, %c0_4] : memref<32x128xf32, #tpu.memory_space<vmem>>, vector<32x128xf32>
    tpu.vector_store %arg4[%c0_3, %c0_4], %2 {strides = array<i32>} : memref<32x128xf32, #tpu.memory_space<vmem>>, vector<32x128xf32>,
    %c0_i32 = arith.constant 0 : i32
    %4 = arith.cmpi eq, %arg1, %c0_i32 : i32
    %5 = arith.extui %4 : i1 to i32
    %c0_i32_5 = arith.constant 0 : i32
    %6 = arith.cmpi ne, %5, %c0_i32_5 : i32
    scf.if %6 {
      %cst_20 = arith.constant 0.000000e+00 : f32
      %20 = vector.broadcast %cst_20 : f32 to vector<1x32x1xf32>
      %c0_21 = arith.constant 0 : index
      %c0_22 = arith.constant 0 : index
      %c0_23 = arith.constant 0 : index
      %21 = vector.load %arg5[%c0_21, %c0_22, %c0_23] : memref<1x32x1xf32, #tpu.memory_space<vmem>>, vector<1x32x1xf32>
      tpu.vector_store %arg5[%c0_21, %c0_22, %c0_23], %20 {strides = array<i32>} : memref<1x32x1xf32, #tpu.memory_space<vmem>>, vector<1x32x1xf32>,
      %cst_24 = arith.constant 0.000000e+00 : f32
      %22 = vector.broadcast %cst_24 : f32 to vector<1x32x1xf32>
      %c0_25 = arith.constant 0 : index
      %c0_26 = arith.constant 0 : index
      %c0_27 = arith.constant 0 : index
      %23 = vector.load %arg6[%c0_25, %c0_26, %c0_27] : memref<1x32x1xf32, #tpu.memory_space<vmem>>, vector<1x32x1xf32>
      tpu.vector_store %arg6[%c0_25, %c0_26, %c0_27], %22 {strides = array<i32>} : memref<1x32x1xf32, #tpu.memory_space<vmem>>, vector<1x32x1xf32>,
    } else {
    }
    %c0_6 = arith.constant 0 : index
    %c0_7 = arith.constant 0 : index
    %c0_8 = arith.constant 0 : index
    %7 = vector.load %arg5[%c0_6, %c0_7, %c0_8] : memref<1x32x1xf32, #tpu.memory_space<vmem>>, vector<1x32x1xf32>
    %cst_9 = arith.constant dense<0.000000e+00> : vector<32xf32>
    %8 = vector.multi_reduction <add>, %2, %cst_9 [1] : vector<32x128xf32> to vector<32xf32>
    %9 = vector.shape_cast %8 : vector<32xf32> to vector<32x1xf32>
    %10 = vector.shape_cast %9 : vector<32x1xf32> to vector<1x32x1xf32>
    %11 = arith.addf %7, %10 : vector<1x32x1xf32>
    %c0_10 = arith.constant 0 : index
    %c0_11 = arith.constant 0 : index
    %c0_12 = arith.constant 0 : index
    %12 = vector.load %arg5[%c0_10, %c0_11, %c0_12] : memref<1x32x1xf32, #tpu.memory_space<vmem>>, vector<1x32x1xf32>
    tpu.vector_store %arg5[%c0_10, %c0_11, %c0_12], %11 {strides = array<i32>} : memref<1x32x1xf32, #tpu.memory_space<vmem>>, vector<1x32x1xf32>,
    %c0_13 = arith.constant 0 : index
    %c0_14 = arith.constant 0 : index
    %c0_15 = arith.constant 0 : index
    %13 = vector.load %arg6[%c0_13, %c0_14, %c0_15] : memref<1x32x1xf32, #tpu.memory_space<vmem>>, vector<1x32x1xf32>
    %14 = arith.mulf %2, %2 : vector<32x128xf32>
    %cst_16 = arith.constant dense<0.000000e+00> : vector<32xf32>
    %15 = vector.multi_reduction <add>, %14, %cst_16 [1] : vector<32x128xf32> to vector<32xf32>
    %16 = vector.shape_cast %15 : vector<32xf32> to vector<32x1xf32>
    %17 = vector.shape_cast %16 : vector<32x1xf32> to vector<1x32x1xf32>
    %18 = arith.addf %13, %17 : vector<1x32x1xf32>
    %c0_17 = arith.constant 0 : index
    %c0_18 = arith.constant 0 : index
    %c0_19 = arith.constant 0 : index
    %19 = vector.load %arg6[%c0_17, %c0_18, %c0_19] : memref<1x32x1xf32, #tpu.memory_space<vmem>>, vector<1x32x1xf32>
    tpu.vector_store %arg6[%c0_17, %c0_18, %c0_19], %18 {strides = array<i32>} : memref<1x32x1xf32, #tpu.memory_space<vmem>>, vector<1x32x1xf32>,
    return
  }
  func.func @transform_0(%arg0: i32, %arg1: i32) -> (i32, i32) {
    %c2_i32 = arith.constant 2 : i32
    %0 = arith.muli %arg0, %c2_i32 : i32
    %1 = arith.addi %0, %arg1 : i32
    %c0_i32 = arith.constant 0 : i32
    %c0_i32_0 = arith.constant 0 : i32
    return %c0_i32, %1 : i32, i32
  }
  func.func @transform_1(%arg0: i32, %arg1: i32) -> (i32, i32) {
    %c0_i32 = arith.constant 0 : i32
    %c0_i32_0 = arith.constant 0 : i32
    %c0_i32_1 = arith.constant 0 : i32
    return %c0_i32, %c0_i32_0 : i32, i32
  }
  func.func @transform_2(%arg0: i32, %arg1: i32) -> (i32, i32) {
    %c2_i32 = arith.constant 2 : i32
    %0 = arith.muli %arg0, %c2_i32 : i32
    %1 = arith.addi %0, %arg1 : i32
    %c0_i32 = arith.constant 0 : i32
    %c0_i32_0 = arith.constant 0 : i32
    return %c0_i32, %1 : i32, i32
  }
  func.func @transform_3(%arg0: i32, %arg1: i32) -> (i32, i32, i32) {
    %c0_i32 = arith.constant 0 : i32
    %c0_i32_0 = arith.constant 0 : i32
    %c0_i32_1 = arith.constant 0 : i32
    return %arg0, %c0_i32, %c0_i32_0 : i32, i32, i32
  }
  func.func @transform_4(%arg0: i32, %arg1: i32) -> (i32, i32, i32) {
    %c0_i32 = arith.constant 0 : i32
    %c0_i32_0 = arith.constant 0 : i32
    %c0_i32_1 = arith.constant 0 : i32
    return %arg0, %c0_i32, %c0_i32_0 : i32, i32, i32
  }
}

module attributes {stable_mosaic.version = 11 : i64} {
  func.func @kernel(%arg0: i32, %arg1: i32, %arg2: memref<32x128xbf16, #tpu.memory_space<vmem>>, %arg3: memref<32x128xf32, #tpu.memory_space<vmem>>, %arg4: memref<32x1xf32, #tpu.memory_space<vmem>>, %arg5: memref<32x1xf32, #tpu.memory_space<vmem>>, %arg6: memref<16x32xbf16, #tpu.memory_space<vmem>>, %arg7: memref<16x32xbf16, #tpu.memory_space<vmem>>, %arg8: memref<16x128xf32, #tpu.memory_space<vmem>>, %arg9: memref<1x16x1xf32, #tpu.memory_space<vmem>>, %arg10: memref<1x16x1xf32, #tpu.memory_space<vmem>>) attributes {dimension_semantics = [#tpu.dimension_semantics<parallel>, #tpu.dimension_semantics<arbitrary>], iteration_bounds = array<i64: 2, 2>, scalar_prefetch = 0 : i64, scratch_operands = 0 : i64, tpu.core_type = #tpu.core_type<tc>, window_params = [{transform_indices = @transform_0, window_bounds = array<i64: 32, 128>}, {transform_indices = @transform_1, window_bounds = array<i64: 32, 128>}, {pipeline_mode = #tpu.pipeline_mode<synchronous>, transform_indices = @transform_2, window_bounds = array<i64: 32, 1>}, {pipeline_mode = #tpu.pipeline_mode<synchronous>, transform_indices = @transform_3, window_bounds = array<i64: 32, 1>}, {pipeline_mode = #tpu.pipeline_mode<synchronous>, transform_indices = @transform_4, window_bounds = array<i64: 16, 32>}, {pipeline_mode = #tpu.pipeline_mode<synchronous>, transform_indices = @transform_5, window_bounds = array<i64: 16, 32>}, {transform_indices = @transform_6, window_bounds = array<i64: 16, 128>}, {transform_indices = @transform_7, window_bounds = array<i64: 1, 16, 1>}, {transform_indices = @transform_8, window_bounds = array<i64: 1, 16, 1>}]} {
    %c0 = arith.constant 0 : index
    %c0_0 = arith.constant 0 : index
    %0 = vector.load %arg2[%c0, %c0_0] : memref<32x128xbf16, #tpu.memory_space<vmem>>, vector<32x128xbf16>
    %c0_1 = arith.constant 0 : index
    %c0_2 = arith.constant 0 : index
    %1 = vector.load %arg3[%c0_1, %c0_2] : memref<32x128xf32, #tpu.memory_space<vmem>>, vector<32x128xf32>
    %c0_3 = arith.constant 0 : index
    %c0_4 = arith.constant 0 : index
    %2 = vector.load %arg4[%c0_3, %c0_4] : memref<32x1xf32, #tpu.memory_space<vmem>>, vector<32x1xf32>
    %3 = vector.broadcast %2 : vector<32x1xf32> to vector<32x128xf32>
    %4 = arith.mulf %1, %3 : vector<32x128xf32>
    %c0_5 = arith.constant 0 : index
    %c0_6 = arith.constant 0 : index
    %5 = vector.load %arg5[%c0_5, %c0_6] : memref<32x1xf32, #tpu.memory_space<vmem>>, vector<32x1xf32>
    %6 = vector.broadcast %5 : vector<32x1xf32> to vector<32x128xf32>
    %7 = arith.addf %4, %6 : vector<32x128xf32>
    %cst = arith.constant 0.000000e+00 : f32
    %8 = vector.broadcast %cst : f32 to vector<32x128xf32>
    %9 = arith.cmpf oge, %7, %8 : vector<32x128xf32>
    %cst_7 = arith.constant 2.000000e-01 : f32
    %10 = vector.broadcast %cst_7 : f32 to vector<32x128xf32>
    %11 = arith.mulf %10, %7 : vector<32x128xf32>
    %12 = arith.select %9, %7, %11 : vector<32x128xi1>, vector<32x128xf32>
    %13 = arith.truncf %12 : vector<32x128xf32> to vector<32x128xbf16>
    %c0_8 = arith.constant 0 : index
    %c0_9 = arith.constant 0 : index
    %14 = vector.load %arg6[%c0_8, %c0_9] : memref<16x32xbf16, #tpu.memory_space<vmem>>, vector<16x32xbf16>
    %cst_10 = arith.constant dense<0.000000e+00> : vector<16x128xf32>
    %15 = tpu.matmul %14, %0, %cst_10 {dimension_numbers = #tpu.dot_dimension_numbers<[1], [0], [0], [1], [0, 0, 1, 1], [], []>} : vector<16x32xbf16>, vector<32x128xbf16>, vector<16x128xf32> -> vector<16x128xf32>
    %c0_11 = arith.constant 0 : index
    %c0_12 = arith.constant 0 : index
    %16 = vector.load %arg7[%c0_11, %c0_12] : memref<16x32xbf16, #tpu.memory_space<vmem>>, vector<16x32xbf16>
    %cst_13 = arith.constant dense<0.000000e+00> : vector<16x128xf32>
    %17 = tpu.matmul %16, %13, %cst_13 {dimension_numbers = #tpu.dot_dimension_numbers<[1], [0], [0], [1], [0, 0, 1, 1], [], []>} : vector<16x32xbf16>, vector<32x128xbf16>, vector<16x128xf32> -> vector<16x128xf32>
    %18 = arith.addf %15, %17 : vector<16x128xf32>
    %c0_14 = arith.constant 0 : index
    %c0_15 = arith.constant 0 : index
    %19 = vector.load %arg8[%c0_14, %c0_15] : memref<16x128xf32, #tpu.memory_space<vmem>>, vector<16x128xf32>
    tpu.vector_store %arg8[%c0_14, %c0_15], %18 {strides = array<i32>} : memref<16x128xf32, #tpu.memory_space<vmem>>, vector<16x128xf32>,
    %c0_i32 = arith.constant 0 : i32
    %20 = arith.cmpi eq, %arg1, %c0_i32 : i32
    %21 = arith.extui %20 : i1 to i32
    %c0_i32_16 = arith.constant 0 : i32
    %22 = arith.cmpi ne, %21, %c0_i32_16 : i32
    scf.if %22 {
      %cst_31 = arith.constant 0.000000e+00 : f32
      %36 = vector.broadcast %cst_31 : f32 to vector<1x16x1xf32>
      %c0_32 = arith.constant 0 : index
      %c0_33 = arith.constant 0 : index
      %c0_34 = arith.constant 0 : index
      %37 = vector.load %arg9[%c0_32, %c0_33, %c0_34] : memref<1x16x1xf32, #tpu.memory_space<vmem>>, vector<1x16x1xf32>
      tpu.vector_store %arg9[%c0_32, %c0_33, %c0_34], %36 {strides = array<i32>} : memref<1x16x1xf32, #tpu.memory_space<vmem>>, vector<1x16x1xf32>,
      %cst_35 = arith.constant 0.000000e+00 : f32
      %38 = vector.broadcast %cst_35 : f32 to vector<1x16x1xf32>
      %c0_36 = arith.constant 0 : index
      %c0_37 = arith.constant 0 : index
      %c0_38 = arith.constant 0 : index
      %39 = vector.load %arg10[%c0_36, %c0_37, %c0_38] : memref<1x16x1xf32, #tpu.memory_space<vmem>>, vector<1x16x1xf32>
      tpu.vector_store %arg10[%c0_36, %c0_37, %c0_38], %38 {strides = array<i32>} : memref<1x16x1xf32, #tpu.memory_space<vmem>>, vector<1x16x1xf32>,
    } else {
    }
    %c0_17 = arith.constant 0 : index
    %c0_18 = arith.constant 0 : index
    %c0_19 = arith.constant 0 : index
    %23 = vector.load %arg9[%c0_17, %c0_18, %c0_19] : memref<1x16x1xf32, #tpu.memory_space<vmem>>, vector<1x16x1xf32>
    %cst_20 = arith.constant dense<0.000000e+00> : vector<16xf32>
    %24 = vector.multi_reduction <add>, %18, %cst_20 [1] : vector<16x128xf32> to vector<16xf32>
    %25 = vector.shape_cast %24 : vector<16xf32> to vector<16x1xf32>
    %26 = vector.shape_cast %25 : vector<16x1xf32> to vector<1x16x1xf32>
    %27 = arith.addf %23, %26 : vector<1x16x1xf32>
    %c0_21 = arith.constant 0 : index
    %c0_22 = arith.constant 0 : index
    %c0_23 = arith.constant 0 : index
    %28 = vector.load %arg9[%c0_21, %c0_22, %c0_23] : memref<1x16x1xf32, #tpu.memory_space<vmem>>, vector<1x16x1xf32>
    tpu.vector_store %arg9[%c0_21, %c0_22, %c0_23], %27 {strides = array<i32>} : memref<1x16x1xf32, #tpu.memory_space<vmem>>, vector<1x16x1xf32>,
    %c0_24 = arith.constant 0 : index
    %c0_25 = arith.constant 0 : index
    %c0_26 = arith.constant 0 : index
    %29 = vector.load %arg10[%c0_24, %c0_25, %c0_26] : memref<1x16x1xf32, #tpu.memory_space<vmem>>, vector<1x16x1xf32>
    %30 = arith.mulf %18, %18 : vector<16x128xf32>
    %cst_27 = arith.constant dense<0.000000e+00> : vector<16xf32>
    %31 = vector.multi_reduction <add>, %30, %cst_27 [1] : vector<16x128xf32> to vector<16xf32>
    %32 = vector.shape_cast %31 : vector<16xf32> to vector<16x1xf32>
    %33 = vector.shape_cast %32 : vector<16x1xf32> to vector<1x16x1xf32>
    %34 = arith.addf %29, %33 : vector<1x16x1xf32>
    %c0_28 = arith.constant 0 : index
    %c0_29 = arith.constant 0 : index
    %c0_30 = arith.constant 0 : index
    %35 = vector.load %arg10[%c0_28, %c0_29, %c0_30] : memref<1x16x1xf32, #tpu.memory_space<vmem>>, vector<1x16x1xf32>
    tpu.vector_store %arg10[%c0_28, %c0_29, %c0_30], %34 {strides = array<i32>} : memref<1x16x1xf32, #tpu.memory_space<vmem>>, vector<1x16x1xf32>,
    return
  }
  func.func @transform_0(%arg0: i32, %arg1: i32) -> (i32, i32) {
    %c2_i32 = arith.constant 2 : i32
    %0 = arith.muli %arg0, %c2_i32 : i32
    %1 = arith.addi %0, %arg1 : i32
    %c0_i32 = arith.constant 0 : i32
    %c0_i32_0 = arith.constant 0 : i32
    return %c0_i32, %1 : i32, i32
  }
  func.func @transform_1(%arg0: i32, %arg1: i32) -> (i32, i32) {
    %c2_i32 = arith.constant 2 : i32
    %0 = arith.muli %arg0, %c2_i32 : i32
    %1 = arith.addi %0, %arg1 : i32
    %c0_i32 = arith.constant 0 : i32
    %c0_i32_0 = arith.constant 0 : i32
    return %c0_i32, %1 : i32, i32
  }
  func.func @transform_2(%arg0: i32, %arg1: i32) -> (i32, i32) {
    %c0_i32 = arith.constant 0 : i32
    %c0_i32_0 = arith.constant 0 : i32
    %c0_i32_1 = arith.constant 0 : i32
    return %c0_i32, %c0_i32_0 : i32, i32
  }
  func.func @transform_3(%arg0: i32, %arg1: i32) -> (i32, i32) {
    %c0_i32 = arith.constant 0 : i32
    %c0_i32_0 = arith.constant 0 : i32
    %c0_i32_1 = arith.constant 0 : i32
    return %c0_i32, %c0_i32_0 : i32, i32
  }
  func.func @transform_4(%arg0: i32, %arg1: i32) -> (i32, i32) {
    %c0_i32 = arith.constant 0 : i32
    %c0_i32_0 = arith.constant 0 : i32
    %c0_i32_1 = arith.constant 0 : i32
    return %c0_i32, %c0_i32_0 : i32, i32
  }
  func.func @transform_5(%arg0: i32, %arg1: i32) -> (i32, i32) {
    %c0_i32 = arith.constant 0 : i32
    %c0_i32_0 = arith.constant 0 : i32
    %c0_i32_1 = arith.constant 0 : i32
    return %c0_i32, %c0_i32_0 : i32, i32
  }
  func.func @transform_6(%arg0: i32, %arg1: i32) -> (i32, i32) {
    %c2_i32 = arith.constant 2 : i32
    %0 = arith.muli %arg0, %c2_i32 : i32
    %1 = arith.addi %0, %arg1 : i32
    %c0_i32 = arith.constant 0 : i32
    %c0_i32_0 = arith.constant 0 : i32
    return %c0_i32, %1 : i32, i32
  }
  func.func @transform_7(%arg0: i32, %arg1: i32) -> (i32, i32, i32) {
    %c0_i32 = arith.constant 0 : i32
    %c0_i32_0 = arith.constant 0 : i32
    %c0_i32_1 = arith.constant 0 : i32
    return %arg0, %c0_i32, %c0_i32_0 : i32, i32, i32
  }
  func.func @transform_8(%arg0: i32, %arg1: i32) -> (i32, i32, i32) {
    %c0_i32 = arith.constant 0 : i32
    %c0_i32_0 = arith.constant 0 : i32
    %c0_i32_1 = arith.constant 0 : i32
    return %arg0, %c0_i32, %c0_i32_0 : i32, i32, i32
  }
}

module attributes {stable_mosaic.version = 11 : i64} {
  func.func @kernel(%arg0: i32, %arg1: memref<16x256xf32, #tpu.memory_space<vmem>>, %arg2: memref<16x1xf32, #tpu.memory_space<vmem>>, %arg3: memref<16x1xf32, #tpu.memory_space<vmem>>, %arg4: memref<16x1xf32, #tpu.memory_space<vmem>>, %arg5: memref<1x1xf32, #tpu.memory_space<vmem>>, %arg6: memref<32x16xf32, #tpu.memory_space<vmem>>, %arg7: memref<32x1xf32, #tpu.memory_space<vmem>>, %arg8: memref<16x1xf32, #tpu.memory_space<vmem>>, %arg9: memref<16x1xf32, #tpu.memory_space<vmem>>, %arg10: memref<16x1xf32, #tpu.memory_space<vmem>>, %arg11: memref<16x1xf32, #tpu.memory_space<vmem>>, %arg12: memref<16x16xf32, #tpu.memory_space<vmem>>, %arg13: memref<16x1xf32, #tpu.memory_space<vmem>>, %arg14: memref<16x16xf32, #tpu.memory_space<vmem>>, %arg15: memref<16x1xf32, #tpu.memory_space<vmem>>, %arg16: memref<16x256xf32, #tpu.memory_space<vmem>>) attributes {dimension_semantics = [#tpu.dimension_semantics<parallel>], iteration_bounds = array<i64: 2>, scalar_prefetch = 0 : i64, scratch_operands = 0 : i64, tpu.core_type = #tpu.core_type<tc>, window_params = [{transform_indices = @transform_0, window_bounds = array<i64: 16, 256>}, {pipeline_mode = #tpu.pipeline_mode<synchronous>, transform_indices = @transform_1, window_bounds = array<i64: 16, 1>}, {pipeline_mode = #tpu.pipeline_mode<synchronous>, transform_indices = @transform_2, window_bounds = array<i64: 16, 1>}, {pipeline_mode = #tpu.pipeline_mode<synchronous>, transform_indices = @transform_3, window_bounds = array<i64: 16, 1>}, {pipeline_mode = #tpu.pipeline_mode<synchronous>, transform_indices = @transform_4, window_bounds = array<i64: 1, 1>}, {pipeline_mode = #tpu.pipeline_mode<synchronous>, transform_indices = @transform_5, window_bounds = array<i64: 32, 16>}, {pipeline_mode = #tpu.pipeline_mode<synchronous>, transform_indices = @transform_6, window_bounds = array<i64: 32, 1>}, {pipeline_mode = #tpu.pipeline_mode<synchronous>, transform_indices = @transform_7, window_bounds = array<i64: 16, 1>}, {pipeline_mode = #tpu.pipeline_mode<synchronous>, transform_indices = @transform_8, window_bounds = array<i64: 16, 1>}, {pipeline_mode = #tpu.pipeline_mode<synchronous>, transform_indices = @transform_9, window_bounds = array<i64: 16, 1>}, {pipeline_mode = #tpu.pipeline_mode<synchronous>, transform_indices = @transform_10, window_bounds = array<i64: 16, 1>}, {pipeline_mode = #tpu.pipeline_mode<synchronous>, transform_indices = @transform_11, window_bounds = array<i64: 16, 16>}, {pipeline_mode = #tpu.pipeline_mode<synchronous>, transform_indices = @transform_12, window_bounds = array<i64: 16, 1>}, {pipeline_mode = #tpu.pipeline_mode<synchronous>, transform_indices = @transform_13, window_bounds = array<i64: 16, 16>}, {pipeline_mode = #tpu.pipeline_mode<synchronous>, transform_indices = @transform_14, window_bounds = array<i64: 16, 1>}, {transform_indices = @transform_15, window_bounds = array<i64: 16, 256>}]} {
    %c0 = arith.constant 0 : index
    %c0_0 = arith.constant 0 : index
    %0 = vector.load %arg1[%c0, %c0_0] : memref<16x256xf32, #tpu.memory_space<vmem>>, vector<16x256xf32>
    %c0_1 = arith.constant 0 : index
    %c0_2 = arith.constant 0 : index
    %1 = vector.load %arg2[%c0_1, %c0_2] : memref<16x1xf32, #tpu.memory_space<vmem>>, vector<16x1xf32>
    %2 = vector.broadcast %1 : vector<16x1xf32> to vector<16x256xf32>
    %3 = arith.mulf %0, %2 : vector<16x256xf32>
    %c0_3 = arith.constant 0 : index
    %c0_4 = arith.constant 0 : index
    %4 = vector.load %arg3[%c0_3, %c0_4] : memref<16x1xf32, #tpu.memory_space<vmem>>, vector<16x1xf32>
    %5 = vector.broadcast %4 : vector<16x1xf32> to vector<16x256xf32>
    %6 = arith.addf %3, %5 : vector<16x256xf32>
    %cst = arith.constant 0.000000e+00 : f32
    %7 = vector.broadcast %cst : f32 to vector<16x256xf32>
    %8 = arith.cmpf oge, %6, %7 : vector<16x256xf32>
    %cst_5 = arith.constant 2.000000e-01 : f32
    %9 = vector.broadcast %cst_5 : f32 to vector<16x256xf32>
    %10 = arith.mulf %9, %6 : vector<16x256xf32>
    %11 = arith.select %8, %6, %10 : vector<16x256xi1>, vector<16x256xf32>
    %c0_6 = arith.constant 0 : index
    %c0_7 = arith.constant 0 : index
    %12 = vector.load %arg4[%c0_6, %c0_7] : memref<16x1xf32, #tpu.memory_space<vmem>>, vector<16x1xf32>
    %13 = vector.broadcast %12 : vector<16x1xf32> to vector<16x256xf32>
    %14 = arith.mulf %11, %13 : vector<16x256xf32>
    %cst_8 = arith.constant dense<0.000000e+00> : vector<256xf32>
    %15 = vector.multi_reduction <add>, %14, %cst_8 [0] : vector<16x256xf32> to vector<256xf32>
    %16 = vector.shape_cast %15 : vector<256xf32> to vector<1x256xf32>
    %c0_9 = arith.constant 0 : index
    %c0_10 = arith.constant 0 : index
    %17 = vector.load %arg5[%c0_9, %c0_10] : memref<1x1xf32, #tpu.memory_space<vmem>>, vector<1x1xf32>
    %18 = vector.broadcast %17 : vector<1x1xf32> to vector<1x256xf32>
    %19 = arith.addf %16, %18 : vector<1x256xf32>
    %cst_11 = arith.constant dense<0xFF800000> : vector<1xf32>
    %20 = vector.multi_reduction <maximumf>, %19, %cst_11 [1] : vector<1x256xf32> to vector<1xf32>
    %21 = vector.shape_cast %20 : vector<1xf32> to vector<1x1xf32>
    %22 = vector.broadcast %21 : vector<1x1xf32> to vector<1x256xf32>
    %23 = arith.subf %19, %22 : vector<1x256xf32>
    %24 = math.exp %23 : vector<1x256xf32>
    %cst_12 = arith.constant dense<0.000000e+00> : vector<1xf32>
    %25 = vector.multi_reduction <add>, %24, %cst_12 [1] : vector<1x256xf32> to vector<1xf32>
    %26 = vector.shape_cast %25 : vector<1xf32> to vector<1x1xf32>
    %27 = vector.broadcast %26 : vector<1x1xf32> to vector<1x256xf32>
    %28 = arith.divf %24, %27 : vector<1x256xf32>
    %cst_13 = arith.constant dense<0.000000e+00> : vector<16x1xf32>
    %29 = tpu.matmul %11, %28, %cst_13 {dimension_numbers = #tpu.dot_dimension_numbers<[1], [1], [0], [0], [0, 0, 1, 0], [], []>} : vector<16x256xf32>, vector<1x256xf32>, vector<16x1xf32> -> vector<16x1xf32>
    %c0_14 = arith.constant 0 : index
    %c0_15 = arith.constant 0 : index
    %30 = vector.load %arg6[%c0_14, %c0_15] : memref<32x16xf32, #tpu.memory_space<vmem>>, vector<32x16xf32>
    %cst_16 = arith.constant dense<0.000000e+00> : vector<32x1xf32>
    %31 = tpu.matmul %30, %29, %cst_16 {dimension_numbers = #tpu.dot_dimension_numbers<[1], [0], [0], [1], [0, 0, 1, 1], [], []>} : vector<32x16xf32>, vector<16x1xf32>, vector<32x1xf32> -> vector<32x1xf32>
    %c0_17 = arith.constant 0 : index
    %c0_18 = arith.constant 0 : index
    %32 = vector.load %arg7[%c0_17, %c0_18] : memref<32x1xf32, #tpu.memory_space<vmem>>, vector<32x1xf32>
    %33 = arith.addf %31, %32 : vector<32x1xf32>
    %34 = vector.extract_strided_slice %33 {offsets = [0, 0], sizes = [16, 1], strides = [1, 1]} : vector<32x1xf32> to vector<16x1xf32>
    %35 = vector.extract_strided_slice %33 {offsets = [16, 0], sizes = [16, 1], strides = [1, 1]} : vector<32x1xf32> to vector<16x1xf32>
    %c0_19 = arith.constant 0 : index
    %c0_20 = arith.constant 0 : index
    %36 = vector.load %arg8[%c0_19, %c0_20] : memref<16x1xf32, #tpu.memory_space<vmem>>, vector<16x1xf32>
    %c0_21 = arith.constant 0 : index
    %c0_22 = arith.constant 0 : index
    %37 = vector.load %arg9[%c0_21, %c0_22] : memref<16x1xf32, #tpu.memory_space<vmem>>, vector<16x1xf32>
    %cst_23 = arith.constant dense<0.000000e+00> : vector<1xf32>
    %38 = vector.multi_reduction <add>, %34, %cst_23 [0] : vector<16x1xf32> to vector<1xf32>
    %39 = vector.shape_cast %38 : vector<1xf32> to vector<1x1xf32>
    %cst_24 = arith.constant 1.600000e+01 : f32
    %40 = vector.broadcast %cst_24 : f32 to vector<1x1xf32>
    %41 = arith.divf %39, %40 : vector<1x1xf32>
    %42 = vector.broadcast %41 : vector<1x1xf32> to vector<16x1xf32>
    %43 = arith.subf %34, %42 : vector<16x1xf32>
    %44 = vector.broadcast %41 : vector<1x1xf32> to vector<16x1xf32>
    %45 = arith.subf %34, %44 : vector<16x1xf32>
    %46 = arith.mulf %43, %45 : vector<16x1xf32>
    %cst_25 = arith.constant dense<0.000000e+00> : vector<1xf32>
    %47 = vector.multi_reduction <add>, %46, %cst_25 [0] : vector<16x1xf32> to vector<1xf32>
    %48 = vector.shape_cast %47 : vector<1xf32> to vector<1x1xf32>
    %cst_26 = arith.constant 1.600000e+01 : f32
    %49 = vector.broadcast %cst_26 : f32 to vector<1x1xf32>
    %50 = arith.divf %48, %49 : vector<1x1xf32>
    %51 = vector.broadcast %41 : vector<1x1xf32> to vector<16x1xf32>
    %52 = arith.subf %34, %51 : vector<16x1xf32>
    %cst_27 = arith.constant 9.99999974E-6 : f32
    %53 = vector.broadcast %cst_27 : f32 to vector<1x1xf32>
    %54 = arith.addf %50, %53 : vector<1x1xf32>
    %55 = math.rsqrt %54 : vector<1x1xf32>
    %56 = vector.broadcast %55 : vector<1x1xf32> to vector<16x1xf32>
    %57 = arith.mulf %52, %56 : vector<16x1xf32>
    %58 = arith.mulf %57, %36 : vector<16x1xf32>
    %59 = arith.addf %58, %37 : vector<16x1xf32>
    %cst_28 = arith.constant 0.000000e+00 : f32
    %60 = vector.broadcast %cst_28 : f32 to vector<16x1xf32>
    %61 = arith.maximumf %59, %60 : vector<16x1xf32>
    %c0_29 = arith.constant 0 : index
    %c0_30 = arith.constant 0 : index
    %62 = vector.load %arg10[%c0_29, %c0_30] : memref<16x1xf32, #tpu.memory_space<vmem>>, vector<16x1xf32>
    %c0_31 = arith.constant 0 : index
    %c0_32 = arith.constant 0 : index
    %63 = vector.load %arg11[%c0_31, %c0_32] : memref<16x1xf32, #tpu.memory_space<vmem>>, vector<16x1xf32>
    %cst_33 = arith.constant dense<0.000000e+00> : vector<1xf32>
    %64 = vector.multi_reduction <add>, %35, %cst_33 [0] : vector<16x1xf32> to vector<1xf32>
    %65 = vector.shape_cast %64 : vector<1xf32> to vector<1x1xf32>
    %cst_34 = arith.constant 1.600000e+01 : f32
    %66 = vector.broadcast %cst_34 : f32 to vector<1x1xf32>
    %67 = arith.divf %65, %66 : vector<1x1xf32>
    %68 = vector.broadcast %67 : vector<1x1xf32> to vector<16x1xf32>
    %69 = arith.subf %35, %68 : vector<16x1xf32>
    %70 = vector.broadcast %67 : vector<1x1xf32> to vector<16x1xf32>
    %71 = arith.subf %35, %70 : vector<16x1xf32>
    %72 = arith.mulf %69, %71 : vector<16x1xf32>
    %cst_35 = arith.constant dense<0.000000e+00> : vector<1xf32>
    %73 = vector.multi_reduction <add>, %72, %cst_35 [0] : vector<16x1xf32> to vector<1xf32>
    %74 = vector.shape_cast %73 : vector<1xf32> to vector<1x1xf32>
    %cst_36 = arith.constant 1.600000e+01 : f32
    %75 = vector.broadcast %cst_36 : f32 to vector<1x1xf32>
    %76 = arith.divf %74, %75 : vector<1x1xf32>
    %77 = vector.broadcast %67 : vector<1x1xf32> to vector<16x1xf32>
    %78 = arith.subf %35, %77 : vector<16x1xf32>
    %cst_37 = arith.constant 9.99999974E-6 : f32
    %79 = vector.broadcast %cst_37 : f32 to vector<1x1xf32>
    %80 = arith.addf %76, %79 : vector<1x1xf32>
    %81 = math.rsqrt %80 : vector<1x1xf32>
    %82 = vector.broadcast %81 : vector<1x1xf32> to vector<16x1xf32>
    %83 = arith.mulf %78, %82 : vector<16x1xf32>
    %84 = arith.mulf %83, %62 : vector<16x1xf32>
    %85 = arith.addf %84, %63 : vector<16x1xf32>
    %cst_38 = arith.constant 0.000000e+00 : f32
    %86 = vector.broadcast %cst_38 : f32 to vector<16x1xf32>
    %87 = arith.maximumf %85, %86 : vector<16x1xf32>
    %c0_39 = arith.constant 0 : index
    %c0_40 = arith.constant 0 : index
    %88 = vector.load %arg12[%c0_39, %c0_40] : memref<16x16xf32, #tpu.memory_space<vmem>>, vector<16x16xf32>
    %cst_41 = arith.constant dense<0.000000e+00> : vector<16x1xf32>
    %89 = tpu.matmul %88, %61, %cst_41 {dimension_numbers = #tpu.dot_dimension_numbers<[1], [0], [0], [1], [0, 0, 1, 1], [], []>} : vector<16x16xf32>, vector<16x1xf32>, vector<16x1xf32> -> vector<16x1xf32>
    %c0_42 = arith.constant 0 : index
    %c0_43 = arith.constant 0 : index
    %90 = vector.load %arg13[%c0_42, %c0_43] : memref<16x1xf32, #tpu.memory_space<vmem>>, vector<16x1xf32>
    %91 = arith.addf %89, %90 : vector<16x1xf32>
    %92 = arith.negf %91 : vector<16x1xf32>
    %93 = math.exp %92 : vector<16x1xf32>
    %cst_44 = arith.constant 1.000000e+00 : f32
    %94 = vector.broadcast %cst_44 : f32 to vector<16x1xf32>
    %95 = arith.addf %94, %93 : vector<16x1xf32>
    %96 = arith.divf %94, %95 : vector<16x1xf32>
    %c0_45 = arith.constant 0 : index
    %c0_46 = arith.constant 0 : index
    %97 = vector.load %arg14[%c0_45, %c0_46] : memref<16x16xf32, #tpu.memory_space<vmem>>, vector<16x16xf32>
    %cst_47 = arith.constant dense<0.000000e+00> : vector<16x1xf32>
    %98 = tpu.matmul %97, %87, %cst_47 {dimension_numbers = #tpu.dot_dimension_numbers<[1], [0], [0], [1], [0, 0, 1, 1], [], []>} : vector<16x16xf32>, vector<16x1xf32>, vector<16x1xf32> -> vector<16x1xf32>
    %c0_48 = arith.constant 0 : index
    %c0_49 = arith.constant 0 : index
    %99 = vector.load %arg15[%c0_48, %c0_49] : memref<16x1xf32, #tpu.memory_space<vmem>>, vector<16x1xf32>
    %100 = arith.addf %98, %99 : vector<16x1xf32>
    %101 = vector.broadcast %96 : vector<16x1xf32> to vector<16x256xf32>
    %102 = arith.mulf %11, %101 : vector<16x256xf32>
    %103 = vector.broadcast %100 : vector<16x1xf32> to vector<16x256xf32>
    %104 = arith.addf %102, %103 : vector<16x256xf32>
    %c0_50 = arith.constant 0 : index
    %c0_51 = arith.constant 0 : index
    %105 = vector.load %arg16[%c0_50, %c0_51] : memref<16x256xf32, #tpu.memory_space<vmem>>, vector<16x256xf32>
    tpu.vector_store %arg16[%c0_50, %c0_51], %104 {strides = array<i32>} : memref<16x256xf32, #tpu.memory_space<vmem>>, vector<16x256xf32>,
    return
  }
  func.func @transform_0(%arg0: i32) -> (i32, i32) {
    %c0_i32 = arith.constant 0 : i32
    %c0_i32_0 = arith.constant 0 : i32
    return %c0_i32, %arg0 : i32, i32
  }
  func.func @transform_1(%arg0: i32) -> (i32, i32) {
    %c0_i32 = arith.constant 0 : i32
    %c0_i32_0 = arith.constant 0 : i32
    %c0_i32_1 = arith.constant 0 : i32
    return %c0_i32, %c0_i32_0 : i32, i32
  }
  func.func @transform_2(%arg0: i32) -> (i32, i32) {
    %c0_i32 = arith.constant 0 : i32
    %c0_i32_0 = arith.constant 0 : i32
    %c0_i32_1 = arith.constant 0 : i32
    return %c0_i32, %c0_i32_0 : i32, i32
  }
  func.func @transform_3(%arg0: i32) -> (i32, i32) {
    %c0_i32 = arith.constant 0 : i32
    %c0_i32_0 = arith.constant 0 : i32
    %c0_i32_1 = arith.constant 0 : i32
    return %c0_i32, %c0_i32_0 : i32, i32
  }
  func.func @transform_4(%arg0: i32) -> (i32, i32) {
    %c0_i32 = arith.constant 0 : i32
    %c0_i32_0 = arith.constant 0 : i32
    %c0_i32_1 = arith.constant 0 : i32
    return %c0_i32, %c0_i32_0 : i32, i32
  }
  func.func @transform_5(%arg0: i32) -> (i32, i32) {
    %c0_i32 = arith.constant 0 : i32
    %c0_i32_0 = arith.constant 0 : i32
    %c0_i32_1 = arith.constant 0 : i32
    return %c0_i32, %c0_i32_0 : i32, i32
  }
  func.func @transform_6(%arg0: i32) -> (i32, i32) {
    %c0_i32 = arith.constant 0 : i32
    %c0_i32_0 = arith.constant 0 : i32
    %c0_i32_1 = arith.constant 0 : i32
    return %c0_i32, %c0_i32_0 : i32, i32
  }
  func.func @transform_7(%arg0: i32) -> (i32, i32) {
    %c0_i32 = arith.constant 0 : i32
    %c0_i32_0 = arith.constant 0 : i32
    %c0_i32_1 = arith.constant 0 : i32
    return %c0_i32, %c0_i32_0 : i32, i32
  }
  func.func @transform_8(%arg0: i32) -> (i32, i32) {
    %c0_i32 = arith.constant 0 : i32
    %c0_i32_0 = arith.constant 0 : i32
    %c0_i32_1 = arith.constant 0 : i32
    return %c0_i32, %c0_i32_0 : i32, i32
  }
  func.func @transform_9(%arg0: i32) -> (i32, i32) {
    %c0_i32 = arith.constant 0 : i32
    %c0_i32_0 = arith.constant 0 : i32
    %c0_i32_1 = arith.constant 0 : i32
    return %c0_i32, %c0_i32_0 : i32, i32
  }
  func.func @transform_10(%arg0: i32) -> (i32, i32) {
    %c0_i32 = arith.constant 0 : i32
    %c0_i32_0 = arith.constant 0 : i32
    %c0_i32_1 = arith.constant 0 : i32
    return %c0_i32, %c0_i32_0 : i32, i32
  }
  func.func @transform_11(%arg0: i32) -> (i32, i32) {
    %c0_i32 = arith.constant 0 : i32
    %c0_i32_0 = arith.constant 0 : i32
    %c0_i32_1 = arith.constant 0 : i32
    return %c0_i32, %c0_i32_0 : i32, i32
  }
  func.func @transform_12(%arg0: i32) -> (i32, i32) {
    %c0_i32 = arith.constant 0 : i32
    %c0_i32_0 = arith.constant 0 : i32
    %c0_i32_1 = arith.constant 0 : i32
    return %c0_i32, %c0_i32_0 : i32, i32
  }
  func.func @transform_13(%arg0: i32) -> (i32, i32) {
    %c0_i32 = arith.constant 0 : i32
    %c0_i32_0 = arith.constant 0 : i32
    %c0_i32_1 = arith.constant 0 : i32
    return %c0_i32, %c0_i32_0 : i32, i32
  }
  func.func @transform_14(%arg0: i32) -> (i32, i32) {
    %c0_i32 = arith.constant 0 : i32
    %c0_i32_0 = arith.constant 0 : i32
    %c0_i32_1 = arith.constant 0 : i32
    return %c0_i32, %c0_i32_0 : i32, i32
  }
  func.func @transform_15(%arg0: i32) -> (i32, i32) {
    %c0_i32 = arith.constant 0 : i32
    %c0_i32_0 = arith.constant 0 : i32
    return %c0_i32, %arg0 : i32, i32
  }
}

</mosaic_0001>

<bundles_post_ra>
// kernel: dense_attn_2d_forward.3
= control target key start
LH: loop header
LB: loop body
LE: loop exit
PB: predicated region body
PF: predicated region fallthrough
CT: control target
= control target key end

     0   :  { %s825_s15 = smov 0   ;;  %s827_s16 = smov 0   ;;  %s980_s0 = inlined_call_operand.vmem [shape: bf16[32,512], index: 0, kind: input, shape index: {}]   ;;  %s981_s1 = inlined_call_operand.vmem [shape: bf16[32,32], index: 1, kind: input, shape index: {}]   ;;  %s982_s2 = inlined_call_operand.vmem [shape: f32[32,512], index: 2, kind: output, shape index: {0}]   ;;  %s983_s3 = inlined_call_operand.vmem [shape: f32[2,32,1], index: 3, kind: output, shape index: {1}]   ;;  %s984_s4 = inlined_call_operand.vmem [shape: f32[2,32,1], index: 4, kind: output, shape index: {2}]  }
   0x1   :  { %s829_s17 = smov 0   ;;  %s831_s18 = smov 0  }
   0x2   :  { %s833_s19 = smov 0   ;;  %s835_s20 = smov 0  }
   0x3   :  { %s837_s21 = smov 0  }
   0x4 LB: > { %s24_s22 = sadd.s32 1, %s789_s19  ;;  %s27_s23 = sadd.s32 1, %s793_s20  ;;  %s797_s21 = sphi %s837_s21, %s15_s21   ;;  %s793_s20 = sphi %s835_s20, %s991_s20   ;;  %s789_s19 = sphi %s833_s19, %s990_s19   ;;  %s785_s18 = sphi %s831_s18, %s989_s18   ;;  %s781_s17 = sphi %s829_s17, %s988_s17   ;;  %s777_s16 = sphi %s827_s16, %s987_s16   ;;  %s773_s15 = sphi %s825_s15, %s986_s15  }
   0x5   : > { %p25_p0 = scmp.ge.s32.totalorder %s24_s22, 2  ;;  %s638_s24 = sadd.s32 4294967295, %s797_s21  }
   0x6   : > { %s640_s25 = sshll.u32 %s793_s20, 1  ;;  %p45_p1 = scmp.ne.s32.totalorder %s777_s16, %s773_s15 }
   0x7   : > { %s993_s22 = smov (%p25_p0, %s24_s22), 0  ;;  %s995_s23 = smov (!%p25_p0, %s27_s23), %s793_s20 }
   0x8   : > { %p29_p2 = scmp.ge.s32.totalorder %s995_s23, 2  ;;  %p46_p3 = scmp.eq.s32.totalorder %s797_s21, 0 }
   0x9   : > { %s32_s26 = sadd.s32 %s789_s19, %s640_s25  ;;  %p100_p4 = scmp.eq.s32.totalorder %s638_s24, 3 }
   0xa   : > { %s997_s23 = smov (%p29_p2, %s995_s23), 0  ;;  %p47_p5 = por %p46_p3, %p45_p1 }
   0xb   : > { %p873_p6 = por %p100_p4, %p45_p1  ;;  %s641_s28 = sshll.u32 %s997_s23, 1 }
   0xc   : > { %s34_s29 = sadd.s32 %s641_s28, %s993_s22  ;;  %s38_s5 = sadd.s32 1, %s777_s16 }
   0xd   : > { %s35_s30 = ssub.s32 %s32_s26, %s34_s29  ;;  %p645_p8 = scmp.ge.s32.totalorder %s797_s21, 4 }
   0xe   : > { %p36_p7 = scmp.eq.s32.totalorder %s35_s30, 0 }
   0xf   : > { %177 = sbr.rel (%p645_p8) target bundleno = 29 (0x1d), region = 20 }
  0x10   : > { %s881_s6 = scalar_select %p36_p7, %s777_s16, %s38_s5  }
  0x16   : > { %180 = sbr.rel (!%p47_p5) target bundleno = 29 (0x1d), region = 24  ;;  %s182_s7 = sand.u32 (%p47_p5), 1, %s777_s16  }
  0x17   : > { %s648_s8 = sshll.u32 (%p47_p5), %s32_s26, 2  ;;  %s646_s9 = sshll.u32 (%p47_p5), %s182_s7, 4 }
  0x18   : > { %s188_s12 = scalar_lea.vmem (%p47_p5), %s980_s0, %s648_s8  ;;  %s184_s13 = scalar_lea.vmem (%p47_p5), [#allocation2], %s646_s9 }
  0x19   : > { %v204_v0 = vld [vmem:[%s188_s12] sm:$0xf] (%p47_p5)  ;;  %v206_v1 = vld [vmem:[%s188_s12 + $0x10] sm:$0xf] (%p47_p5) }
  0x1a   : > { %205 = vst [vmem:[%s184_s13] sm:$0xf] (%p47_p5), %v204_v0  ;;  %207 = vst [vmem:[%s184_s13 + $0x4] sm:$0xf] (%p47_p5), %v206_v1  ;;  %v208_v2 = vld [vmem:[%s188_s12 + $0x20] sm:$0xf] (%p47_p5) }
  0x1b   : > { %v210_v3 = vld [vmem:[%s188_s12 + $0x30] sm:$0xf] (%p47_p5)  ;;  %209 = vst [vmem:[%s184_s13 + $0x8] sm:$0xf] (%p47_p5), %v208_v2 }
  0x1c   : > { %211 = vst [vmem:[%s184_s13 + $0xc] sm:$0xf] (%p47_p5), %v210_v3 }
  0x1d PF: > { %p649_p9 = scmp.ge.s32.totalorder %s797_s21, 1  ;;  %p241_p10 = scmp.lt.s32.totalorder %s797_s21, 5 }
  0x1f   : > { %p242_p11 = pnand %p649_p9, %p241_p10 }
  0x20   : > { %s248_s14 = sand.u32 (!%p242_p11), 1, %s773_s15   ;;  %p286_p12 = scmp.lt.s32.totalorder (!%p242_p11), %s785_s18, 1  ;;  %v741_v4 = vld [vmem:[%s981_s1] sm:$0xff] (!%p242_p11)   ;;  %vm327_vm0 = vcmask (!%p242_p11), 261120   ;;  %v742_v7 = vld [vmem:[%s981_s1 + $0x8] sm:$0xff] (!%p242_p11)  }
  0x21   : > { %245 = sbr.rel (%p242_p11) target bundleno = 417 (0x1a1), region = 65  ;;  %s650_s24 = sshll.u32 (!%p242_p11), %s248_s14, 4  ;;  %678 = vmatprep.mubr.msk.bf16.mxu0 (!%p242_p11), %vm327_vm0, %v741_v4 }
  0x22   : > { %s250_s29 = scalar_lea.vmem (!%p242_p11), [#allocation2], %s650_s24  ;;  %s651_s13 = sshll.u32 (!%p242_p11), %s248_s14, 5 }
  0x23   : > { %v739_v5 = vld [vmem:[%s250_s29] sm:$0xff] (!%p242_p11)   ;;  %v740_v6 = vld [vmem:[%s250_s29 + $0x8] sm:$0xff] (!%p242_p11)   ;;  %s909_s24 = scalar_lea.vmem (!%p242_p11), [#allocation3], %s651_s13  ;;  %p662_p13 = scmp.ne.s32.totalorder (!%p242_p11), %s781_s17, 0 }
  0x24   : > { %674 = vmatprep.subr.bf16.mxu0 (!%p242_p11), %v739_v5 }
  0x25   : > { %675 = vmatpush3.bf16.msra.mxu0 (!%p242_p11), %v739_v5 }
  0x26   : > { %676 = vmatprep.subr.bf16.mxu0 (!%p242_p11), %v740_v6 }
  0x28   : > { %s287_s28 = scalar_select %p286_p12, %s785_s18, 1 }
  0x29   : > { %677 = vmatpush3.bf16.msra.mxu0 %v740_v6  ;;  %vm391_vm1 = vcmask (!%p662_p13), 7168   ;;  %v799_v12 = vmov (!%p662_p13), 0.0  }
  0x2a   : > { %s668_s30 = sshll.u32 %s287_s28, 5 }
  0x2b   : > { %s899_s8 = scalar_lea.vmem %s983_s3, %s668_s30  ;;  %s904_s10 = scalar_lea.vmem %s984_s4, %s668_s30 }
  0x2c   : > { %679 = vmatmul.mubr.msk.bf16.vlgmr.msra.gmra.mrb[0].mxu0 %vm327_vm0, %v742_v7  ;;  %392 = vst.msk [vmem:[%s899_s8] sm:$0xff] (!%p662_p13), %vm391_vm1, %v799_v12  ;;  %393 = vst.msk [vmem:[%s899_s8 + $0x8] sm:$0xff] (!%p662_p13), %vm391_vm1, %v799_v12 }
  0x2d   : > { %394 = vst.msk [vmem:[%s899_s8 + $0x10] sm:$0xff] (!%p662_p13), %vm391_vm1, %v799_v12  ;;  %395 = vst.msk [vmem:[%s899_s8 + $0x18] sm:$0xff] (!%p662_p13), %vm391_vm1, %v799_v12 }
  0x2e   : > { %396 = vst.msk [vmem:[%s904_s10] sm:$0xff] (!%p662_p13), %vm391_vm1, %v799_v12  ;;  %397 = vst.msk [vmem:[%s904_s10 + $0x8] sm:$0xff] (!%p662_p13), %vm391_vm1, %v799_v12 }
  0x2f   : > { %398 = vst.msk [vmem:[%s904_s10 + $0x10] sm:$0xff] (!%p662_p13), %vm391_vm1, %v799_v12  ;;  %399 = vst.msk [vmem:[%s904_s10 + $0x18] sm:$0xff] (!%p662_p13), %vm391_vm1, %v799_v12 }
  0xfd   : > { %390 = sbr.rel (%p662_p13) target bundleno = 260 (0x104), region = 73 }
  0xff   : > { %v680_v8 = vpop.f32.mrb[0].mxu0 }
 0x100   : > { %385 = vst [vmem:[%s909_s24 + $0x10] sm:$0xff] %v680_v8  ;;  %v368_v9 = vpop.f32.mrb[1].mxu0 }
 0x101   : > { %383 = vst [vmem:[%s909_s24] sm:$0xff] %v368_v9  ;;  %v681_v10 = vpop.f32.mrb[2].mxu0 }
 0x102   : > { %386 = vst [vmem:[%s909_s24 + $0x18] sm:$0xff] %v681_v10  ;;  %v371_v11 = vpop.f32.mrb[3].mxu0 }
 0x103   : > { %384 = vst [vmem:[%s909_s24 + $0x8] sm:$0xff] %v371_v11 }
 0x104 PF: > { %408 = vadd.xlane.f32.xlu1 %v680_v8  ;;  %404 = vadd.xlane.f32.xlu0 %v368_v9  ;;  %v426_v13 = vmul.f32 %v371_v11, %v371_v11  ;;  %v425_v14 = vmul.f32 %v368_v9, %v368_v9  ;;  %v428_v15 = vmul.f32 %v681_v10, %v681_v10  ;;  %v402_v17 = vld [vmem:[%s899_s8 + $0x10] sm:$0xff]  ;;  %v400_v18 = vld [vmem:[%s899_s8] sm:$0xff]  ;;  %vm416_vm2 = vcmask 7168   ;;  %v403_v23 = vld [vmem:[%s899_s8 + $0x18] sm:$0xff]  ;;  %s664_s14 = sshll.u32 (%p873_p6), %s785_s18, 1 }
 0x105   : > { %v427_v16 = vmul.f32 %v680_v8, %v680_v8  ;;  %v401_v24 = vld [vmem:[%s899_s8 + $0x8] sm:$0xff]  ;;  %v421_v30 = vld [vmem:[%s904_s10] sm:$0xff]  ;;  %v424_v35 = vld [vmem:[%s904_s10 + $0x18] sm:$0xff]  ;;  %s463_s25 = sadd.s32 (%p873_p6), %s781_s17, %s664_s14 }
 0x106   : > { %v422_v29 = vld [vmem:[%s904_s10 + $0x8] sm:$0xff]  ;;  %v423_v36 = vld [vmem:[%s904_s10 + $0x10] sm:$0xff]  ;;  %s665_s26 = sshll.u32 (%p873_p6), %s463_s25, 3 }
 0x107   : > { %v503_v43 = vld [vmem:[%s909_s24 + $0x10] sm:$0xff] (%p873_p6)  ;;  %s465_s30 = scalar_lea.vmem (%p873_p6), %s982_s2, %s665_s26 }
 0x108   : > { %410 = vadd.xlane.f32.xlu1 %v681_v10  ;;  %406 = vadd.xlane.f32.xlu0 %v371_v11  ;;  %v499_v41 = vld [vmem:[%s909_s24] sm:$0xff] (%p873_p6)  ;;  %504 = vst [vmem:[%s465_s30 + $0x40] sm:$0xff] (%p873_p6), %v503_v43 }
 0x109   : > { %v505_v44 = vld [vmem:[%s909_s24 + $0x18] sm:$0xff] (%p873_p6)  ;;  %500 = vst [vmem:[%s465_s30] sm:$0xff] (%p873_p6), %v499_v41 }
 0x10a   : > { %v501_v42 = vld [vmem:[%s909_s24 + $0x8] sm:$0xff] (%p873_p6)  ;;  %506 = vst [vmem:[%s465_s30 + $0x60] sm:$0xff] (%p873_p6), %v505_v44 }
 0x10b   : > { %502 = vst [vmem:[%s465_s30 + $0x20] sm:$0xff] (%p873_p6), %v501_v42 }
 0x10c   : > { %431 = vadd.xlane.f32.xlu1 %v426_v13  ;;  %429 = vadd.xlane.f32.xlu0 %v425_v14 }
 0x110   : > { %435 = vadd.xlane.f32.xlu1 %v428_v15  ;;  %433 = vadd.xlane.f32.xlu0 %v427_v16 }
 0x191   : > { %v409_v19 = vpop.xlane.xlu1 %408  ;;  %v405_v20 = vpop.xlane.xlu0 %404 }
 0x192   : > { %v414_v21 = vadd.f32 %v409_v19, %v402_v17  ;;  %v412_v22 = vadd.f32 %v405_v20, %v400_v18 }
 0x194   : > { %419 = vst.msk [vmem:[%s899_s8 + $0x10] sm:$0xff] %vm416_vm2, %v414_v21  ;;  %417 = vst.msk [vmem:[%s899_s8] sm:$0xff] %vm416_vm2, %v412_v22 }
 0x195   : > { %v411_v25 = vpop.xlane.xlu1 %410  ;;  %v407_v26 = vpop.xlane.xlu0 %406 }
 0x196   : > { %v415_v27 = vadd.f32 %v411_v25, %v403_v23  ;;  %v413_v28 = vadd.f32 %v407_v26, %v401_v24 }
 0x198   : > { %420 = vst.msk [vmem:[%s899_s8 + $0x18] sm:$0xff] %vm416_vm2, %v415_v27  ;;  %418 = vst.msk [vmem:[%s899_s8 + $0x8] sm:$0xff] %vm416_vm2, %v413_v28 }
 0x199   : > { %v432_v31 = vpop.xlane.xlu1 %431  ;;  %v430_v32 = vpop.xlane.xlu0 %429 }
 0x19a   : > { %v438_v33 = vadd.f32 %v432_v31, %v422_v29  ;;  %v437_v34 = vadd.f32 %v430_v32, %v421_v30  ;;  %461 = sbr.rel (!%p873_p6) target bundleno = 417 (0x1a1), region = 77 }
 0x19c   : > { %442 = vst.msk [vmem:[%s904_s10 + $0x8] sm:$0xff] %vm416_vm2, %v438_v33  ;;  %441 = vst.msk [vmem:[%s904_s10] sm:$0xff] %vm416_vm2, %v437_v34 }
 0x19d   : > { %v436_v37 = vpop.xlane.xlu1 %435  ;;  %v434_v38 = vpop.xlane.xlu0 %433 }
 0x19e   : > { %v440_v39 = vadd.f32 %v436_v37, %v424_v35  ;;  %v439_v40 = vadd.f32 %v434_v38, %v423_v36 }
 0x1a0   : > { %444 = vst.msk [vmem:[%s904_s10 + $0x18] sm:$0xff] %vm416_vm2, %v440_v39  ;;  %443 = vst.msk [vmem:[%s904_s10 + $0x10] sm:$0xff] %vm416_vm2, %v439_v40 }
 0x1a1 PF: > { %s15_s21 = sadd.s32 1, %s797_s21   ;;  %s986_s15 = smov %s777_s16 }
 0x1a2   : > { %p12_p0 = scmp.ge.s32.totalorder %s15_s21, 6   ;;  %s987_s16 = smov %s881_s6 }
 0x1a3   : > { %s988_s17 = smov %s789_s19  ;;  %s989_s18 = smov %s793_s20 }
 0x1a4   : > { %s990_s19 = smov %s993_s22  ;;  %s991_s20 = smov %s997_s23 }
 0x1a5   :  { %14 = sbr.rel (!%p12_p0) target bundleno = 4 (0x4), region = 170 }

// kernel: dense_attn_2d_forward.4
= control target key start
LH: loop header
LB: loop body
LE: loop exit
PB: predicated region body
PF: predicated region fallthrough
CT: control target
= control target key end

     0   :  { %s1322_s0 = inlined_call_operand.vmem [shape: bf16[32,512], index: 0, kind: input, shape index: {}]   ;;  %s1323_s1 = inlined_call_operand.vmem [shape: f32[32,512], index: 1, kind: input, shape index: {}]   ;;  %s1324_s2 = inlined_call_operand.vmem [shape: f32[32,1], index: 2, kind: input, shape index: {}]   ;;  %s1325_s3 = inlined_call_operand.vmem [shape: f32[32,1], index: 3, kind: input, shape index: {}]   ;;  %s1326_s4 = inlined_call_operand.vmem [shape: bf16[16,32], index: 4, kind: input, shape index: {}]   ;;  %s1327_s5 = inlined_call_operand.vmem [shape: bf16[16,32], index: 5, kind: input, shape index: {}]   ;;  %s1328_s6 = inlined_call_operand.vmem [shape: f32[16,512], index: 6, kind: output, shape index: {0}]   ;;  %s1329_s7 = inlined_call_operand.vmem [shape: f32[2,16,1], index: 7, kind: output, shape index: {1}]   ;;  %s1330_s8 = inlined_call_operand.vmem [shape: f32[2,16,1], index: 8, kind: output, shape index: {2}]  }
   0x1   :  { %1331 = sst [smem:[#allocation5_spill]] %s1322_s0 }
   0x2   :  { %1332 = sst [smem:[#allocation6_spill]] %s1323_s1 }
   0x3   :  { %s1144_s27 = smov 0   ;;  %s1146_s28 = smov 0  }
   0x4   :  { %s1148_s29 = smov 0   ;;  %s1150_s30 = smov 0  }
   0x5   :  { %s1152_s9 = smov 0   ;;  %s1154_s10 = smov 0  }
   0x6   :  { %s1156_s11 = smov 0  }
   0x7 LB: > { %s28_s12 = sadd.s32 1, %s1085_s9  ;;  %s31_s13 = sadd.s32 1, %s1089_s10  ;;  %s1093_s11 = sphi %s1156_s11, %s19_s11   ;;  %s1089_s10 = sphi %s1154_s10, %s1342_s10   ;;  %s1085_s9 = sphi %s1152_s9, %s1341_s9   ;;  %s1081_s30 = sphi %s1150_s30, %s1340_s30   ;;  %s1077_s29 = sphi %s1148_s29, %s1339_s29   ;;  %s1073_s28 = sphi %s1146_s28, %s1338_s28   ;;  %s1069_s27 = sphi %s1144_s27, %s1337_s27  }
   0x8   : > { %p29_p0 = scmp.ge.s32.totalorder %s28_s12, 2  ;;  %s911_s14 = sadd.s32 4294967295, %s1093_s11  }
   0x9   : > { %s913_s15 = sshll.u32 %s1089_s10, 1  ;;  %p49_p1 = scmp.ne.s32.totalorder %s1073_s28, %s1069_s27 }
   0xa   : > { %s1344_s12 = smov (%p29_p0, %s28_s12), 0  ;;  %s1346_s13 = smov (!%p29_p0, %s31_s13), %s1089_s10 }
   0xb   : > { %p33_p2 = scmp.ge.s32.totalorder %s1346_s13, 2  ;;  %p50_p3 = scmp.eq.s32.totalorder %s1093_s11, 0 }
   0xc   : > { %s1190_s16 = sadd.s32 %s1085_s9, %s913_s15  ;;  %p197_p4 = scmp.eq.s32.totalorder %s911_s14, 3 }
   0xd   : > { %s1348_s13 = smov (%p33_p2, %s1346_s13), 0  ;;  %p1194_p5 = por %p50_p3, %p49_p1 }
   0xe   : > { %p1198_p6 = por %p197_p4, %p49_p1  ;;  %s914_s19 = sshll.u32 %s1348_s13, 1 }
   0xf   : > { %s38_s20 = sadd.s32 %s914_s19, %s1344_s12  ;;  %s42_s22 = sadd.s32 1, %s1073_s28 }
  0x10   : > { %s39_s21 = ssub.s32 %s1190_s16, %s38_s20  ;;  %p920_p8 = scmp.ge.s32.totalorder %s1093_s11, 4 }
  0x11   : > { %p40_p7 = scmp.eq.s32.totalorder %s39_s21, 0 }
  0x12   : > { %283 = sbr.rel (%p920_p8) target bundleno = 52 (0x34), region = 32 }
  0x13   : > { %s1207_s23 = scalar_select %p40_p7, %s1073_s28, %s42_s22  }
  0x19   : > { %286 = sbr.rel (!%p1194_p5) target bundleno = 38 (0x26), region = 36  ;;  %s288_s24 = sand.u32 (%p1194_p5), 1, %s1073_s28  }
  0x1a   : > { %s923_s25 = sshll.u32 (%p1194_p5), %s1190_s16, 2  ;;  %s921_s26 = sshll.u32 (%p1194_p5), %s288_s24, 4 }
  0x1b   : > { %s1335_s0 = sld [smem:[#allocation5_spill]] (%p1194_p5)  ;;  %s290_s20 = scalar_lea.vmem (%p1194_p5), [#allocation2], %s921_s26 }
  0x21   : > { %s294_s19 = scalar_lea.vmem %s1335_s0, %s923_s25 }
  0x22   : > { %v310_v0 = vld [vmem:[%s294_s19] sm:$0xf]  ;;  %v312_v1 = vld [vmem:[%s294_s19 + $0x10] sm:$0xf] }
  0x23   : > { %311 = vst [vmem:[%s290_s20] sm:$0xf] %v310_v0  ;;  %313 = vst [vmem:[%s290_s20 + $0x4] sm:$0xf] %v312_v1  ;;  %v314_v2 = vld [vmem:[%s294_s19 + $0x20] sm:$0xf] }
  0x24   : > { %v316_v3 = vld [vmem:[%s294_s19 + $0x30] sm:$0xf]  ;;  %315 = vst [vmem:[%s290_s20 + $0x8] sm:$0xf] %v314_v2 }
  0x25   : > { %317 = vst [vmem:[%s290_s20 + $0xc] sm:$0xf] %v316_v3 }
  0x26 PF: > { %348 = sbr.rel (!%p1194_p5) target bundleno = 52 (0x34), region = 77  ;;  %s350_s21 = sand.u32 (%p1194_p5), 1, %s1073_s28  }
  0x27   : > { %s926_s22 = sshll.u32 (%p1194_p5), %s1190_s16, 3  ;;  %s924_s24 = sshll.u32 (%p1194_p5), %s350_s21, 5 }
  0x28   : > { %s1336_s1 = sld [smem:[#allocation6_spill]] (%p1194_p5)  ;;  %s352_s26 = scalar_lea.vmem (%p1194_p5), [#allocation3], %s924_s24 }
  0x2e   : > { %s356_s15 = scalar_lea.vmem %s1336_s1, %s926_s22 }
  0x2f   : > { %v390_v4 = vld [vmem:[%s356_s15] sm:$0xff] }
  0x30   : > { %v392_v5 = vld [vmem:[%s356_s15 + $0x20] sm:$0xff]  ;;  %391 = vst [vmem:[%s352_s26] sm:$0xff] %v390_v4 }
  0x31   : > { %v394_v6 = vld [vmem:[%s356_s15 + $0x40] sm:$0xff]  ;;  %393 = vst [vmem:[%s352_s26 + $0x8] sm:$0xff] %v392_v5 }
  0x32   : > { %395 = vst [vmem:[%s352_s26 + $0x10] sm:$0xff] %v394_v6  ;;  %v396_v7 = vld [vmem:[%s356_s15 + $0x60] sm:$0xff] }
  0x33   : > { %397 = vst [vmem:[%s352_s26 + $0x18] sm:$0xff] %v396_v7 }
  0x34 PF: > { %p927_p9 = scmp.ge.s32.totalorder %s1093_s11, 1  ;;  %p402_p10 = scmp.lt.s32.totalorder %s1093_s11, 5 }
  0x36   : > { %p403_p11 = pnand %p927_p9, %p402_p10 }
  0x37   : > { %v515_v8 = vld [vmem:[%s1325_s3] sm:$0xff] (!%p403_p11)  ;;  %v1095_v10 = vmov (!%p403_p11), 0   ;;  %v516_v11 = vld [vmem:[%s1325_s3 + $0x8] sm:$0xff] (!%p403_p11)  ;;  %v490_v13 = vld [vmem:[%s1324_s2 + $0x18] sm:$0xff] (!%p403_p11)  ;;  %s409_s17 = sand.u32 (!%p403_p11), 1, %s1069_s27   ;;  %v1096_v17 = vmov (!%p403_p11), 0.0  }
  0x38   : > { %406 = sbr.rel (%p403_p11) target bundleno = 575 (0x23f), region = 115  ;;  %v487_v9 = vld [vmem:[%s1324_s2] sm:$0xff] (!%p403_p11)  ;;  %1034 = vset.pattern.permute.xlu1 (!%p403_p11), %v1095_v10  ;;  %1033 = vset.pattern.permute.xlu0 (!%p403_p11), %v1095_v10  ;;  %v488_v12 = vld [vmem:[%s1324_s2 + $0x8] sm:$0xff] (!%p403_p11)  ;;  %v489_v14 = vld [vmem:[%s1324_s2 + $0x10] sm:$0xff] (!%p403_p11)  ;;  %s1245_s19 = sshll.u32 (!%p403_p11), %s409_s17, 4  ;;  %vm1097_vm0 = vmmov (!%p403_p11), 0  }
  0x39   : > { %521 = vperm.xlu1 (!%p403_p11), %1034, %v515_v8   ;;  %493 = vperm.xlu0 (!%p403_p11), %1033, %v487_v9   ;;  %v518_v15 = vld [vmem:[%s1325_s3 + $0x18] sm:$0xff] (!%p403_p11)  ;;  %v517_v16 = vld [vmem:[%s1325_s3 + $0x10] sm:$0xff] (!%p403_p11)  ;;  %s411_s14 = scalar_lea.vmem (!%p403_p11), [#allocation2], %s1245_s19  ;;  %p468_p12 = scmp.lt.s32.totalorder (!%p403_p11), %s1081_s30, 1  ;;  %v1037_v20 = vld [vmem:[%s1326_s4] sm:$0xff] (!%p403_p11)   ;;  %vm566_vm1 = vcmask (!%p403_p11), 261120  }
  0x3a   : > { %963 = vmatprep.subr.bf16.mxu0 (!%p403_p11), %v1096_v17  ;;  %955 = vmatprep.subr.bf16.mxu1 (!%p403_p11), %v1096_v17  ;;  %v1035_v18 = vld [vmem:[%s411_s14] sm:$0xff] (!%p403_p11)   ;;  %v1036_v19 = vld [vmem:[%s411_s14 + $0x8] sm:$0xff] (!%p403_p11)   ;;  %s929_s0 = sshll.u32 (!%p403_p11), %s409_s17, 5  ;;  %s1275_s17 = scalar_lea.vmem (!%p403_p11), [#allocation4], %s1245_s19 }
  0x3b   : > { %964 = vmatpush3.bf16.msra.mxu0 (!%p403_p11), %v1035_v18  ;;  %967 = vmatprep.mubr.msk.bf16.mxu0 (!%p403_p11), %vm1097_vm0, %v1096_v17  ;;  %s418_s1 = scalar_lea.vmem (!%p403_p11), [#allocation3], %s929_s0  ;;  %v1038_v51 = vld [vmem:[%s1327_s5] sm:$0xff] (!%p403_p11)   ;;  %p941_p13 = scmp.ne.s32.totalorder (!%p403_p11), %s1077_s29, 0 }
  0x3c   : > { %965 = vmatprep.subr.bf16.mxu0 (!%p403_p11), %v1096_v17  ;;  %959 = vmatprep.mubr.msk.bf16.mxu1 (!%p403_p11), %vm1097_vm0, %v1096_v17  ;;  %v483_v21 = vld [vmem:[%s418_s1] sm:$0xff] (!%p403_p11)  ;;  %v484_v25 = vld [vmem:[%s418_s1 + $0x8] sm:$0xff] (!%p403_p11)  ;;  %v486_v33 = vld [vmem:[%s418_s1 + $0x18] sm:$0xff] (!%p403_p11) }
  0x3d   : > { %526 = vperm.xlu1 (!%p403_p11), %1034, %v516_v11   ;;  %498 = vperm.xlu0 (!%p403_p11), %1033, %v488_v12   ;;  %v485_v35 = vld [vmem:[%s418_s1 + $0x10] sm:$0xff] (!%p403_p11) }
  0x3f   : > { %s469_s27 = scalar_select %p468_p12, %s1081_s30, 1  ;;  %966 = vmatpush3.bf16.msra.mxu0 %v1036_v19 }
  0x40   : > { %vm678_vm6 = vcmask (!%p941_p13), 7168   ;;  %v1098_v62 = vmov (!%p941_p13), 0.0  }
  0x41   : > { %508 = vperm.xlu1 %1034, %v490_v13   ;;  %503 = vperm.xlu0 %1033, %v489_v14   ;;  %s947_s26 = sshll.u32 %s469_s27, 4 }
  0x42   : > { %s1262_s21 = scalar_lea.vmem %s1329_s7, %s947_s26  ;;  %s1267_s14 = scalar_lea.vmem %s1330_s8, %s947_s26  ;;  %968 = vmatmul.mubr.msk.bf16.vlgmr.msra.gmra.mrb[0].mxu0 %vm566_vm1, %v1037_v20 }
  0x43   : > { %679 = vst.msk [vmem:[%s1262_s21] sm:$0xff] (!%p941_p13), %vm678_vm6, %v1098_v62  ;;  %680 = vst.msk [vmem:[%s1262_s21 + $0x8] sm:$0xff] (!%p941_p13), %vm678_vm6, %v1098_v62 }
  0x44   : > { %681 = vst.msk [vmem:[%s1267_s14] sm:$0xff] (!%p941_p13), %vm678_vm6, %v1098_v62  ;;  %682 = vst.msk [vmem:[%s1267_s14 + $0x8] sm:$0xff] (!%p941_p13), %vm678_vm6, %v1098_v62 }
  0x45   : > { %536 = vperm.xlu1 %1034, %v518_v15   ;;  %531 = vperm.xlu0 %1033, %v517_v16  }
  0xb8   : > { %v522_v22 = vpop.permute.xlu1 %521  ;;  %v494_v23 = vpop.permute.xlu0 %493 }
  0xb9   : > { %v511_v24 = vmul.f32 %v494_v23, %v483_v21 }
  0xbb   : > { %v539_v26 = vadd.f32 %v522_v22, %v511_v24 }
  0xbc   : > { %v527_v27 = vpop.permute.xlu1 %526  ;;  %v499_v28 = vpop.permute.xlu0 %498 }
  0xbd   : > { %v512_v29 = vmul.f32 %v499_v28, %v484_v25  ;;  %v547_v31 = vmul.f32 0.2, %v539_v26  ;;  %vm543_vm2 = vcmp.ge.f32.partialorder %v539_v26, 0.0 }
  0xbf   : > { %v540_v30 = vadd.f32 %v527_v27, %v512_v29  ;;  %v551_v39 = vsel %vm543_vm2, %v539_v26, %v547_v31 }
  0xc0   : > { %v509_v32 = vpop.permute.xlu1 %508  ;;  %v504_v34 = vpop.permute.xlu0 %503 }
  0xc1   : > { %vm544_vm3 = vcmp.ge.f32.partialorder %v540_v30, 0.0  ;;  %v548_v36 = vmul.f32 0.2, %v540_v30  ;;  %v514_v37 = vmul.f32 %v509_v32, %v486_v33  ;;  %v513_v38 = vmul.f32 %v504_v34, %v485_v35 }
  0xc3   : > { %v552_v40 = vsel %vm544_vm3, %v540_v30, %v548_v36 }
  0xc4   : > { %v537_v41 = vpop.permute.xlu1 %536  ;;  %v532_v42 = vpop.permute.xlu0 %531  ;;  %v555_v43 = vpack.c.bf16 %v552_v40, %v551_v39 }
  0xc5   : > { %v542_v44 = vadd.f32 %v537_v41, %v514_v37  ;;  %v541_v45 = vadd.f32 %v532_v42, %v513_v38 }
  0xc6   : > { %956 = vmatpush3.bf16.msra.mxu1 %v555_v43 }
  0xc7   : > { %vm546_vm4 = vcmp.ge.f32.partialorder %v542_v44, 0.0  ;;  %v550_v46 = vmul.f32 0.2, %v542_v44  ;;  %vm545_vm5 = vcmp.ge.f32.partialorder %v541_v45, 0.0  ;;  %v549_v47 = vmul.f32 0.2, %v541_v45  ;;  %957 = vmatprep.subr.bf16.mxu1 %v1096_v17 }
  0xc9   : > { %v553_v48 = vsel %vm545_vm5, %v541_v45, %v549_v47  ;;  %v554_v49 = vsel %vm546_vm4, %v542_v44, %v550_v46 }
  0xca   : > { %v556_v50 = vpack.c.bf16 %v554_v49, %v553_v48 }
  0xcc   : > { %958 = vmatpush3.bf16.msra.mxu1 %v556_v50 }
  0xcf   : > { %960 = vmatmul.mubr.msk.bf16.vlgmr.msra.gmra.mrb[0].mxu1 %vm566_vm1, %v1038_v51 }
 0x115   : > { %v665_v52 = vpop.f32.mrb[0].mxu0 }
 0x116   : > { %v969_v53 = vpop.f32.mrb[1].mxu0 }
 0x117   : > { %v668_v54 = vpop.f32.mrb[2].mxu0 }
 0x118   : > { %v970_v55 = vpop.f32.mrb[3].mxu0 }
 0x1a1   : > { %677 = sbr.rel (%p941_p13) target bundleno = 424 (0x1a8), region = 127 }
 0x1a2   : > { %v604_v56 = vpop.f32.mrb[0].mxu1 }
 0x1a3   : > { %v666_v57 = vadd.f32 %v665_v52, %v604_v56  ;;  %v961_v58 = vpop.f32.mrb[1].mxu1 }
 0x1a4   : > { %v607_v59 = vpop.f32.mrb[2].mxu1 }
 0x1a5   : > { %672 = vst [vmem:[%s1275_s17] sm:$0xff] %v666_v57  ;;  %v669_v60 = vadd.f32 %v668_v54, %v607_v59  ;;  %v962_v61 = vpop.f32.mrb[3].mxu1 }
 0x1a7   : > { %673 = vst [vmem:[%s1275_s17 + $0x8] sm:$0xff] %v669_v60 }
 0x1a8 PF: > { %685 = vadd.xlane.f32.xlu0 %v666_v57  ;;  %v696_v63 = vmul.f32 %v666_v57, %v666_v57  ;;  %v697_v0 = vmul.f32 %v669_v60, %v669_v60  ;;  %v683_v1 = vld [vmem:[%s1262_s21] sm:$0xff]  ;;  %vm691_vm7 = vcmask 7168   ;;  %v684_v6 = vld [vmem:[%s1262_s21 + $0x8] sm:$0xff]  ;;  %s943_s19 = sshll.u32 (%p1198_p6), %s1081_s30, 1 }
 0x1a9   : > { %v694_v3 = vld [vmem:[%s1267_s14] sm:$0xff]  ;;  %v695_v9 = vld [vmem:[%s1267_s14 + $0x8] sm:$0xff]  ;;  %s724_s27 = sadd.s32 (%p1198_p6), %s1077_s29, %s943_s19 }
 0x1aa   : > { %698 = vadd.xlane.f32.xlu1 %v696_v63  ;;  %s944_s25 = sshll.u32 (%p1198_p6), %s724_s27, 3 }
 0x1ab   : > { %s726_s16 = scalar_lea.vmem (%p1198_p6), %s1328_s6, %s944_s25 }
 0x1ac   : > { %687 = vadd.xlane.f32.xlu0 %v669_v60  ;;  %v756_v13 = vld [vmem:[%s1275_s17] sm:$0xff] (%p1198_p6) }
 0x1ad   : > { %757 = vst [vmem:[%s726_s16] sm:$0xff] (%p1198_p6), %v756_v13 }
 0x1ae   : > { %700 = vadd.xlane.f32.xlu1 %v697_v0  ;;  %v758_v14 = vld [vmem:[%s1275_s17 + $0x8] sm:$0xff] (%p1198_p6) }
 0x1af   : > { %759 = vst [vmem:[%s726_s16 + $0x20] sm:$0xff] (%p1198_p6), %v758_v14 }
 0x235   : > { %v686_v2 = vpop.xlane.xlu0 %685 }
 0x236   : > { %v689_v4 = vadd.f32 %v686_v2, %v683_v1 }
 0x237   : > { %v699_v5 = vpop.xlane.xlu1 %698 }
 0x238   : > { %692 = vst.msk [vmem:[%s1262_s21] sm:$0xff] %vm691_vm7, %v689_v4  ;;  %v702_v7 = vadd.f32 %v699_v5, %v694_v3  ;;  %722 = sbr.rel (!%p1198_p6) target bundleno = 575 (0x23f), region = 131 }
 0x239   : > { %v688_v8 = vpop.xlane.xlu0 %687 }
 0x23a   : > { %704 = vst.msk [vmem:[%s1267_s14] sm:$0xff] %vm691_vm7, %v702_v7  ;;  %v690_v10 = vadd.f32 %v688_v8, %v684_v6 }
 0x23b   : > { %v701_v11 = vpop.xlane.xlu1 %700 }
 0x23c   : > { %693 = vst.msk [vmem:[%s1262_s21 + $0x8] sm:$0xff] %vm691_vm7, %v690_v10  ;;  %v703_v12 = vadd.f32 %v701_v11, %v695_v9 }
 0x23e   : > { %705 = vst.msk [vmem:[%s1267_s14 + $0x8] sm:$0xff] %vm691_vm7, %v703_v12 }
 0x23f PF: > { %s19_s11 = sadd.s32 1, %s1093_s11   ;;  %s1337_s27 = smov %s1073_s28 }
 0x240   : > { %p16_p0 = scmp.ge.s32.totalorder %s19_s11, 6   ;;  %s1338_s28 = smov %s1207_s23 }
 0x241   : > { %s1339_s29 = smov %s1085_s9  ;;  %s1340_s30 = smov %s1089_s10 }
 0x242   : > { %s1341_s9 = smov %s1344_s12  ;;  %s1342_s10 = smov %s1348_s13 }
 0x243   :  { %18 = sbr.rel (!%p16_p0) target bundleno = 7 (0x7), region = 232 }

// kernel: dense_attn_2d_forward.5
= control target key start
LH: loop header
LB: loop body
LE: loop exit
PB: predicated region body
PF: predicated region fallthrough
CT: control target
= control target key end

     0   :  { %s1541_s0 = inlined_call_operand.vmem [shape: f32[16,512], index: 0, kind: input, shape index: {}]   ;;  %s1542_s1 = inlined_call_operand.vmem [shape: f32[16,1], index: 1, kind: input, shape index: {}]   ;;  %s1543_s2 = inlined_call_operand.vmem [shape: f32[16,1], index: 2, kind: input, shape index: {}]   ;;  %s1544_s3 = inlined_call_operand.vmem [shape: f32[16,1], index: 3, kind: input, shape index: {}]   ;;  %s1545_s4 = inlined_call_operand.<no memory space> [shape: f32[1,1], index: 4, kind: input, shape index: {}]   ;;  %s1546_s5 = inlined_call_operand.vmem [shape: f32[32,16], index: 5, kind: input, shape index: {}]   ;;  %s1547_s6 = inlined_call_operand.vmem [shape: f32[32,1], index: 6, kind: input, shape index: {}]   ;;  %s1548_s7 = inlined_call_operand.vmem [shape: f32[16,1], index: 7, kind: input, shape index: {}]   ;;  %s1549_s8 = inlined_call_operand.vmem [shape: f32[16,1], index: 8, kind: input, shape index: {}]   ;;  %s1550_s9 = inlined_call_operand.vmem [shape: f32[16,1], index: 9, kind: input, shape index: {}]   ;;  %s1551_s10 = inlined_call_operand.vmem [shape: f32[16,1], index: 10, kind: input, shape index: {}]   ;;  %s1552_s11 = inlined_call_operand.vmem [shape: f32[16,16], index: 11, kind: input, shape index: {}]   ;;  %s1553_s12 = inlined_call_operand.vmem [shape: f32[16,1], index: 12, kind: input, shape index: {}]   ;;  %s1554_s13 = inlined_call_operand.vmem [shape: f32[16,16], index: 13, kind: input, shape index: {}]   ;;  %s1555_s14 = inlined_call_operand.vmem [shape: f32[16,1], index: 14, kind: input, shape index: {}]   ;;  %s1556_s15 = inlined_call_operand.vmem [shape: f32[16,512], index: 15, kind: output, shape index: {}]  }
   0x1   :  { %v20_v0 = vstv %s1545_s4 }
   0x2   :  { %21 = vst [vmem:[#allocation2] sm:$0x1] %v20_v0 }
   0x3   :  { %s1351_s20 = smov 0   ;;  %s1353_s21 = smov 0  }
   0x4   :  { %s1355_s22 = smov 0  }
   0x5 LB: > { %s1121_s4 = sadd.s32 4294967295, %s1265_s22   ;;  %s1368_s23 = sadd.s32 1, %s1265_s22   ;;  %s1265_s22 = sphi %s1355_s22, %s1560_s22   ;;  %s1261_s21 = sphi %s1353_s21, %s1559_s21   ;;  %s1257_s20 = sphi %s1351_s20, %s1558_s20  }
   0x6   : > { %s31_s24 = ssub.s32 %s1265_s22, %s1368_s23  ;;  %s34_s25 = sadd.s32 1, %s1261_s21 }
   0x7   : > { %p32_p0 = scmp.eq.s32.totalorder %s31_s24, 0  ;;  %p41_p1 = scmp.ne.s32.totalorder %s1261_s21, %s1257_s20 }
   0x8   : > { %p42_p2 = scmp.eq.s32.totalorder %s1265_s22, 0  ;;  %p365_p3 = scmp.eq.s32.totalorder %s1121_s4, 1 }
   0x9   : > { %s1379_s26 = scalar_select %p32_p0, %s1261_s21, %s34_s25  }
   0xa   : > { %p43_p4 = por %p42_p2, %p41_p1  ;;  %p1381_p5 = por %p365_p3, %p41_p1 }
   0xb   : > { %p1124_p6 = scmp.ge.s32.totalorder %s1265_s22, 2 }
   0xd   : > { %429 = sbr.rel (%p1124_p6) target bundleno = 27 (0x1b), region = 72 }
  0x14   : > { %432 = sbr.rel (!%p43_p4) target bundleno = 27 (0x1b), region = 76  ;;  %s434_s28 = sand.u32 (%p43_p4), 1, %s1261_s21  }
  0x15   : > { %s1146_s29 = sshll.u32 (%p43_p4), %s1265_s22, 4  ;;  %s1125_s30 = sshll.u32 (%p43_p4), %s434_s28, 5 }
  0x16   : > { %s439_s18 = scalar_lea.vmem (%p43_p4), %s1541_s0, %s1146_s29  ;;  %s436_s19 = scalar_lea.vmem (%p43_p4), [#allocation3], %s1125_s30 }
  0x17   : > { %v452_v1 = vld [vmem:[%s439_s18] sm:$0xff] (%p43_p4)  ;;  %v454_v2 = vld [vmem:[%s439_s18 + $0x8] sm:$0xff] (%p43_p4) }
  0x18   : > { %v456_v3 = vld [vmem:[%s439_s18 + $0x20] sm:$0xff] (%p43_p4)  ;;  %453 = vst [vmem:[%s436_s19] sm:$0xff] (%p43_p4), %v452_v1  ;;  %455 = vst [vmem:[%s436_s19 + $0x8] sm:$0xff] (%p43_p4), %v454_v2  ;;  %v458_v4 = vld [vmem:[%s439_s18 + $0x28] sm:$0xff] (%p43_p4) }
  0x19   : > { %457 = vst [vmem:[%s436_s19 + $0x10] sm:$0xff] (%p43_p4), %v456_v3  ;;  %459 = vst [vmem:[%s436_s19 + $0x18] sm:$0xff] (%p43_p4), %v458_v4 }
  0x1b PF: > { %p1128_p7 = scmp.ge.s32.totalorder %s1265_s22, 1  ;;  %p464_p8 = scmp.lt.s32.totalorder %s1265_s22, 3 }
  0x1d   : > { %p465_p9 = pnand %p1128_p7, %p464_p8 }
  0x1e   : > { %v539_v5 = vld [vmem:[%s1543_s2] sm:$0xff] (!%p465_p9)  ;;  %v1267_v7 = vmov (!%p465_p9), 0   ;;  %v540_v8 = vld [vmem:[%s1543_s2 + $0x8] sm:$0xff] (!%p465_p9)  ;;  %s471_s29 = sand.u32 (!%p465_p9), 1, %s1257_s20   ;;  %v603_v45 = vlaneseq (!%p465_p9)  ;;  %vm642_vm4 = vcmask (!%p465_p9), 130048   ;;  %vm744_vm5 = vcmask (!%p465_p9), 7168  }
  0x1f   : > { %468 = sbr.rel (%p465_p9) target bundleno = 1322 (0x52a), region = 99  ;;  %v523_v6 = vld [vmem:[%s1542_s1] sm:$0xff] (!%p465_p9)  ;;  %1224 = vset.pattern.permute.xlu1 (!%p465_p9), %v1267_v7  ;;  %1223 = vset.pattern.permute.xlu0 (!%p465_p9), %v1267_v7  ;;  %v524_v9 = vld [vmem:[%s1542_s1 + $0x8] sm:$0xff] (!%p465_p9)  ;;  %s1412_s30 = sshll.u32 (!%p465_p9), %s471_s29, 5 }
  0x20   : > { %543 = vperm.xlu1 (!%p465_p9), %1224, %v539_v5   ;;  %527 = vperm.xlu0 (!%p465_p9), %1223, %v523_v6   ;;  %v568_v10 = vld [vmem:[%s1544_s3 + $0x8] sm:$0xff] (!%p465_p9)  ;;  %v567_v11 = vld [vmem:[%s1544_s3] sm:$0xff] (!%p465_p9)  ;;  %s473_s16 = scalar_lea.vmem (!%p465_p9), [#allocation3], %s1412_s30  ;;  %v604_v50 = vshrl.u32 (!%p465_p9), %v603_v45, 7  ;;  %s516_s19 = scalar_lea.vmem (!%p465_p9), [#allocation4], %s1412_s30 }
  0x21   : > { %v597_v12 = vld [vmem:[#allocation2] sm:$0x1] (!%p465_p9)  ;;  %v519_v13 = vld [vmem:[%s473_s16] sm:$0xff] (!%p465_p9)  ;;  %v520_v14 = vld [vmem:[%s473_s16 + $0x8] sm:$0xff] (!%p465_p9) }
  0x22   : > { %v521_v19 = vld [vmem:[%s473_s16 + $0x10] sm:$0xff] (!%p465_p9)  ;;  %v522_v20 = vld [vmem:[%s473_s16 + $0x18] sm:$0xff] (!%p465_p9)  ;;  %v605_v53 = vsub.s32 (!%p465_p9), 0, %v604_v50 }
  0x24   : > { %548 = vperm.xlu1 (!%p465_p9), %1224, %v540_v8   ;;  %532 = vperm.xlu0 (!%p465_p9), %1223, %v524_v9  }
  0x26   : > { %s1147_s24 = sshll.u32 (%p1381_p5), %s1121_s4, 4 }
  0x27   : > { %s1041_s29 = scalar_lea.vmem (%p1381_p5), %s1556_s15, %s1147_s24 }
  0x28   : > { %576 = vperm.xlu1 %1224, %v568_v10   ;;  %571 = vperm.xlu0 %1223, %v567_v11  }
  0x2c   : > { %600 = vperm.xlu0 %1223, %v597_v12  }
  0x9f   : > { %v544_v15 = vpop.permute.xlu1 %543  ;;  %v528_v16 = vpop.permute.xlu0 %527 }
  0xa0   : > { %v535_v17 = vmul.f32 %v528_v16, %v519_v13  ;;  %v536_v18 = vmul.f32 %v528_v16, %v520_v14 }
  0xa2   : > { %v551_v21 = vadd.f32 %v544_v15, %v535_v17  ;;  %v552_v22 = vadd.f32 %v544_v15, %v536_v18 }
  0xa3   : > { %v533_v23 = vpop.permute.xlu0 %532  ;;  %v549_v26 = vpop.permute.xlu1 %548 }
  0xa4   : > { %v559_v24 = vmul.f32 0.2, %v551_v21  ;;  %v560_v25 = vmul.f32 0.2, %v552_v22  ;;  %v537_v27 = vmul.f32 %v533_v23, %v521_v19  ;;  %v538_v28 = vmul.f32 %v533_v23, %v522_v20  ;;  %v634_v19 = vld [vmem:[%s1546_s5] sm:$0xff]  ;;  %v635_v23 = vld [vmem:[%s1546_s5 + $0x8] sm:$0xff] }
  0xa5   : > { %vm555_vm0 = vcmp.ge.f32.partialorder %v551_v21, 0.0  ;;  %vm556_vm1 = vcmp.ge.f32.partialorder %v552_v22, 0.0  ;;  %1166 = vmatprep.mubr.msk.f32.mxu0 %vm642_vm4, %v634_v19 }
  0xa6   : > { %v553_v29 = vadd.f32 %v549_v26, %v537_v27  ;;  %v554_v30 = vadd.f32 %v549_v26, %v538_v28  ;;  %v1415_v31 = vsel %vm555_vm0, %v551_v21, %v559_v24  ;;  %v1417_v32 = vsel %vm556_vm1, %v552_v22, %v560_v25  ;;  %v636_v24 = vld [vmem:[%s1546_s5 + $0x10] sm:$0xff]  ;;  %v637_v25 = vld [vmem:[%s1546_s5 + $0x18] sm:$0xff]  ;;  %v818_v26 = vld [vmem:[%s1552_s11] sm:$0xff] }
  0xa7   : > { %v572_v35 = vpop.permute.xlu0 %571  ;;  %v577_v36 = vpop.permute.xlu1 %576  ;;  %1176 = vmatprep.mubr.msk.f32.mxu1 %vm642_vm4, %v818_v26  ;;  %v639_v27 = vld [vmem:[%s1547_s6 + $0x8] sm:$0xff]  ;;  %v638_v28 = vld [vmem:[%s1547_s6] sm:$0xff] }
  0xa8   : > { %v561_v33 = vmul.f32 0.2, %v553_v29  ;;  %v562_v34 = vmul.f32 0.2, %v554_v30  ;;  %vm557_vm2 = vcmp.ge.f32.partialorder %v553_v29, 0.0  ;;  %vm558_vm3 = vcmp.ge.f32.partialorder %v554_v30, 0.0 }
  0xa9   : > { %v579_v41 = vmul.f32 %v572_v35, %v1415_v31  ;;  %v580_v42 = vmul.f32 %v572_v35, %v1417_v32  ;;  %v641_v35 = vld [vmem:[%s1547_s6 + $0x18] sm:$0xff] }
  0xaa   : > { %v1419_v37 = vsel %vm557_vm2, %v553_v29, %v561_v33  ;;  %v1421_v38 = vsel %vm558_vm3, %v554_v30, %v562_v34 }
  0xab   : > { %v581_v39 = vmul.f32 %v577_v36, %v1419_v37  ;;  %v582_v40 = vmul.f32 %v577_v36, %v1421_v38  ;;  %v601_v56 = vpop.permute.xlu0 %600 }
  0xac   : > { %v606_v61 = vrot.slane %v601_v56, %v605_v53 }
  0xad   : > { %v583_v43 = vadd.f32 %v581_v39, %v579_v41  ;;  %v590_v44 = vadd.f32 %v582_v40, %v580_v42  ;;  %v640_v39 = vld [vmem:[%s1547_s6 + $0x10] sm:$0xff] }
  0xaf   : > { %v584_v46 = vrot.slane %v583_v43, 4  ;;  %v591_v47 = vrot.slane %v590_v44, 4 }
  0xb1   : > { %v585_v48 = vadd.f32 %v584_v46, %v583_v43  ;;  %v592_v49 = vadd.f32 %v591_v47, %v590_v44 }
  0xb3   : > { %v586_v51 = vrot.slane %v585_v48, 2  ;;  %v593_v52 = vrot.slane %v592_v49, 2 }
  0xb5   : > { %v587_v54 = vadd.f32 %v586_v51, %v585_v48  ;;  %v594_v55 = vadd.f32 %v593_v52, %v592_v49 }
  0xb7   : > { %v588_v57 = vrot.slane %v587_v54, 1  ;;  %v595_v58 = vrot.slane %v594_v55, 1 }
  0xb9   : > { %v589_v59 = vadd.f32 %v588_v57, %v587_v54  ;;  %v596_v60 = vadd.f32 %v595_v58, %v594_v55 }
  0xbb   : > { %v607_v62 = vadd.f32 %v606_v61, %v589_v59  ;;  %v608_v63 = vadd.f32 %v606_v61, %v596_v60 }
  0xbd   : > { %v609_v0 = vmax.f32 %v607_v62, %v608_v63 }
  0xbf   : > { %610 = vmax.xlane.f32.xlu1 %v609_v0 }
 0x14c   : > { %v611_v1 = vpop.xlane.xlu1 %610 }
 0x14d   : > { %v612_v2 = vsub.f32 %v607_v62, %v611_v1  ;;  %v613_v3 = vsub.f32 %v608_v63, %v611_v1 }
 0x14f   : > { %v614_v4 = vmul.f32 1.442695, %v612_v2  ;;  %v616_v5 = vmul.f32 1.442695, %v613_v3 }
 0x151   : > { %1225 = vpow2.f32 %v614_v4 }
 0x152   : > { %1227 = vpow2.f32 %v616_v5 }
 0x15b   : > { %v1226_v6 = vpop.eup %1225 }
 0x15c   : > { %v1228_v7 = vpop.eup %1227 }
 0x15d   : > { %v618_v8 = vadd.f32 %v1228_v7, %v1226_v6 }
 0x15f   : > { %619 = vadd.xlane.f32.xlu0 %v618_v8 }
 0x1ec   : > { %v620_v9 = vpop.xlane.xlu0 %619 }
 0x1ed   : > { %1229 = vrcp.f32 %v620_v9 }
 0x1f7   : > { %v1230_v10 = vpop.eup %1229 }
 0x1f8   : > { %v622_v11 = vmul.f32 %v1230_v10, %v1226_v6  ;;  %v623_v12 = vmul.f32 %v1230_v10, %v1228_v7 }
 0x1fa   : > { %v626_v13 = vmul.f32 %v622_v11, %v1419_v37  ;;  %v627_v14 = vmul.f32 %v623_v12, %v1421_v38  ;;  %v624_v15 = vmul.f32 %v622_v11, %v1415_v31  ;;  %v625_v16 = vmul.f32 %v623_v12, %v1417_v32 }
 0x1fc   : > { %v631_v17 = vadd.f32 %v627_v14, %v626_v13  ;;  %v628_v18 = vadd.f32 %v625_v16, %v624_v15 }
 0x1fe   : > { %632 = vadd.xlane.f32.xlu1 %v631_v17  ;;  %629 = vadd.xlane.f32.xlu0 %v628_v18 }
 0x28b   : > { %v633_v20 = vpop.xlane.xlu1 %632  ;;  %v630_v21 = vpop.xlane.xlu0 %629 }
 0x28c   : > { %v1186_v22 = vpack.c.bf16 %v633_v20, %v630_v21 }
 0x28e   : > { %1187 = vmatprep.subr.bf16.mxu0 %v1186_v22 }
 0x28f   : > { %1189 = vmatpush3.bf16.msra.mxu0 %v1186_v22 }
 0x292   : > { %1167 = vmatmul.mubr.msk.f32.vlgmr.msra.gmra.mrb[0].mxu0 %vm642_vm4, %v635_v23 }
 0x293   : > { %1169 = vmatprep.mubr.msk.f32.mxu0 %vm642_vm4, %v636_v24 }
 0x296   : > { %1170 = vmatmul.mubr.msk.f32.gmra.mrb[2].mxu0 %vm642_vm4, %v637_v25 }
 0x365   : > { %v1168_v29 = vpop.f32.mrb[0].mxu0 }
 0x366   : > { %v727_v30 = vadd.f32 %v1168_v29, %v639_v27  ;;  %v721_v33 = vpop.f32.mrb[1].mxu0 }
 0x367   : > { %v722_v34 = vadd.f32 %v721_v33, %v638_v28  ;;  %v741_v33 = vld [vmem:[%s1548_s7 + $0x8] sm:$0xff] }
 0x368   : > { %v746_v36 = vsel %vm744_vm5, %v727_v30, 0.0 }
 0x369   : > { %v745_v40 = vsel %vm744_vm5, %v722_v34, 0.0  ;;  %v1171_v41 = vpop.f32.mrb[2].mxu0 }
 0x36a   : > { %v747_v42 = vadd.f32 %v746_v36, %v745_v40  ;;  %v737_v43 = vadd.f32 %v1171_v41, %v641_v35  ;;  %v731_v44 = vpop.f32.mrb[3].mxu0  ;;  %v742_v36 = vld [vmem:[%s1549_s8] sm:$0xff] }
 0x36b   : > { %v732_v45 = vadd.f32 %v731_v44, %v640_v39  ;;  %v743_v39 = vld [vmem:[%s1549_s8 + $0x8] sm:$0xff] }
 0x36c   : > { %v748_v46 = vrot.slane %v747_v42, 4  ;;  %v785_v47 = vsel %vm744_vm5, %v737_v43, 0.0  ;;  %v781_v44 = vld [vmem:[%s1550_s9 + $0x8] sm:$0xff] }
 0x36d   : > { %v784_v48 = vsel %vm744_vm5, %v732_v45, 0.0 }
 0x36e   : > { %v749_v49 = vadd.f32 %v748_v46, %v747_v42  ;;  %v786_v50 = vadd.f32 %v785_v47, %v784_v48 }
 0x370   : > { %v750_v51 = vrot.slane %v749_v49, 2  ;;  %v787_v52 = vrot.slane %v786_v50, 4 }
 0x372   : > { %v751_v53 = vadd.f32 %v750_v51, %v749_v49  ;;  %v788_v54 = vadd.f32 %v787_v52, %v786_v50  ;;  %v782_v49 = vld [vmem:[%s1551_s10] sm:$0xff]  ;;  %v783_v50 = vld [vmem:[%s1551_s10 + $0x8] sm:$0xff] }
 0x374   : > { %v752_v55 = vrot.slane %v751_v53, 1  ;;  %v789_v56 = vrot.slane %v788_v54, 2 }
 0x376   : > { %v753_v57 = vadd.f32 %v752_v55, %v751_v53  ;;  %v790_v58 = vadd.f32 %v789_v56, %v788_v54 }
 0x378   : > { %v755_v59 = vmul.f32 0.0625, %v753_v57  ;;  %v791_v60 = vrot.slane %v790_v58, 1 }
 0x37a   : > { %v756_v61 = vsub.f32 %v722_v34, %v755_v59  ;;  %v757_v62 = vsub.f32 %v727_v30, %v755_v59  ;;  %v792_v63 = vadd.f32 %v791_v60, %v790_v58  ;;  %v740_v30 = vld [vmem:[%s1548_s7] sm:$0xff]  ;;  %v819_v60 = vld [vmem:[%s1552_s11 + $0x8] sm:$0xff] }
 0x37c   : > { %v758_v0 = vmul.f32 %v756_v61, %v756_v61  ;;  %v759_v1 = vmul.f32 %v757_v62, %v757_v62  ;;  %v793_v2 = vmul.f32 0.0625, %v792_v63  ;;  %v916_v63 = vld [vmem:[%s1554_s13 + $0x8] sm:$0xff] }
 0x37e   : > { %v760_v3 = vsel %vm744_vm5, %v758_v0, 0.0  ;;  %v761_v4 = vsel %vm744_vm5, %v759_v1, 0.0  ;;  %v794_v5 = vsub.f32 %v732_v45, %v793_v2  ;;  %v795_v6 = vsub.f32 %v737_v43, %v793_v2  ;;  %v780_v43 = vld [vmem:[%s1550_s9] sm:$0xff]  ;;  %v821_v0 = vld [vmem:[%s1553_s12 + $0x8] sm:$0xff] }
 0x37f   : > { %v762_v7 = vadd.f32 %v761_v4, %v760_v3  ;;  %v820_v1 = vld [vmem:[%s1553_s12] sm:$0xff] }
 0x380   : > { %v796_v8 = vmul.f32 %v794_v5, %v794_v5  ;;  %v797_v9 = vmul.f32 %v795_v6, %v795_v6 }
 0x381   : > { %v763_v10 = vrot.slane %v762_v7, 4 }
 0x382   : > { %v798_v11 = vsel %vm744_vm5, %v796_v8, 0.0  ;;  %v799_v12 = vsel %vm744_vm5, %v797_v9, 0.0 }
 0x383   : > { %v764_v13 = vadd.f32 %v763_v10, %v762_v7  ;;  %v800_v14 = vadd.f32 %v799_v12, %v798_v11 }
 0x385   : > { %v765_v15 = vrot.slane %v764_v13, 2  ;;  %v801_v16 = vrot.slane %v800_v14, 4 }
 0x387   : > { %v766_v17 = vadd.f32 %v765_v15, %v764_v13  ;;  %v802_v18 = vadd.f32 %v801_v16, %v800_v14  ;;  %v917_v14 = vld [vmem:[%s1555_s14] sm:$0xff]  ;;  %v918_v15 = vld [vmem:[%s1555_s14 + $0x8] sm:$0xff] }
 0x389   : > { %v767_v19 = vrot.slane %v766_v17, 1  ;;  %v803_v20 = vrot.slane %v802_v18, 2 }
 0x38b   : > { %v768_v21 = vadd.f32 %v767_v19, %v766_v17  ;;  %v804_v22 = vadd.f32 %v803_v20, %v802_v18 }
 0x38d   : > { %v769_v23 = vmul.f32 0.0625, %v768_v21  ;;  %v805_v24 = vrot.slane %v804_v22, 1 }
 0x38f   : > { %v770_v25 = vadd.f32 1e-05, %v769_v23  ;;  %v806_v26 = vadd.f32 %v805_v24, %v804_v22 }
 0x391   : > { %1231 = vrsqrt.f32 %v770_v25  ;;  %v807_v27 = vmul.f32 0.0625, %v806_v26 }
 0x393   : > { %v808_v28 = vadd.f32 1e-05, %v807_v27 }
 0x395   : > { %1233 = vrsqrt.f32 %v808_v28 }
 0x39b   : > { %v1232_v29 = vpop.eup %1231 }
 0x39c   : > { %v772_v34 = vmul.f32 %v1232_v29, %v756_v61  ;;  %v773_v35 = vmul.f32 %v1232_v29, %v757_v62  ;;  %v915_v62 = vld [vmem:[%s1554_s13] sm:$0xff] }
 0x39e   : > { %v774_v40 = vmul.f32 %v772_v34, %v740_v30  ;;  %v775_v41 = vmul.f32 %v773_v35, %v741_v33 }
 0x39f   : > { %v1234_v42 = vpop.eup %1233 }
 0x3a0   : > { %v810_v45 = vmul.f32 %v1234_v42, %v794_v5  ;;  %v811_v46 = vmul.f32 %v1234_v42, %v795_v6  ;;  %v776_v47 = vadd.f32 %v774_v40, %v742_v36  ;;  %v777_v48 = vadd.f32 %v775_v41, %v743_v39 }
 0x3a2   : > { %v812_v51 = vmul.f32 %v810_v45, %v780_v43  ;;  %v778_v52 = vmax.f32 %v776_v47, 0.0  ;;  %v779_v53 = vmax.f32 %v777_v48, 0.0  ;;  %v813_v54 = vmul.f32 %v811_v46, %v781_v44 }
 0x3a4   : > { %v1190_v55 = vpack.c.bf16 %v779_v53, %v778_v52  ;;  %v814_v56 = vadd.f32 %v812_v51, %v782_v49  ;;  %v815_v57 = vadd.f32 %v813_v54, %v783_v50 }
 0x3a6   : > { %1191 = vmatprep.subr.bf16.mxu1 %v1190_v55  ;;  %v816_v58 = vmax.f32 %v814_v56, 0.0  ;;  %v817_v59 = vmax.f32 %v815_v57, 0.0 }
 0x3a7   : > { %1193 = vmatpush3.bf16.msra.mxu1 %v1190_v55 }
 0x3a8   : > { %v1194_v61 = vpack.c.bf16 %v817_v59, %v816_v58 }
 0x3aa   : > { %1177 = vmatmul.mubr.msk.f32.vlgmr.msra.gmra.mrb[0].mxu1 %vm642_vm4, %v819_v60  ;;  %1195 = vmatprep.subr.bf16.mxu1 %v1194_v61 }
 0x3ab   : > { %1197 = vmatpush3.bf16.msra.mxu1 %v1194_v61  ;;  %1183 = vmatprep.mubr.msk.f32.mxu1 %vm642_vm4, %v915_v62 }
 0x3ae   : > { %1184 = vmatmul.mubr.msk.f32.vlgmr.msra.gmra.mrb[2].mxu1 %vm642_vm4, %v916_v63 }
 0x47d   : > { %v1178_v2 = vpop.f32.mrb[0].mxu1 }
 0x47e   : > { %v900_v3 = vadd.f32 %v1178_v2, %v821_v0  ;;  %v894_v4 = vpop.f32.mrb[1].mxu1 }
 0x47f   : > { %v895_v5 = vadd.f32 %v894_v4, %v820_v1 }
 0x480   : > { %v1138_v6 = vmul.f32 -1.442695, %v900_v3 }
 0x481   : > { %v1137_v7 = vmul.f32 -1.442695, %v895_v5  ;;  %v1185_v8 = vpop.f32.mrb[2].mxu1 }
 0x482   : > { %1235 = vpow2.f32 %v1138_v6  ;;  %v991_v9 = vpop.f32.mrb[3].mxu1  ;;  %v997_v19 = vadd.f32 %v1185_v8, %v918_v15 }
 0x483   : > { %1237 = vpow2.f32 %v1137_v7  ;;  %v992_v18 = vadd.f32 %v991_v9, %v917_v14 }
 0x48c   : > { %v1236_v10 = vpop.eup %1235 }
 0x48d   : > { %v1238_v11 = vpop.eup %1237  ;;  %v910_v12 = vadd.f32 1.0, %v1236_v10 }
 0x48e   : > { %v909_v13 = vadd.f32 1.0, %v1238_v11 }
 0x48f   : > { %1239 = vrcp.f32 %v910_v12 }
 0x490   : > { %1241 = vrcp.f32 %v909_v13 }
 0x499   : > { %v1240_v16 = vpop.eup %1239 }
 0x49a   : > { %v1242_v17 = vpop.eup %1241  ;;  %1007 = vperm.xlu1 %1224, %v1240_v16  }
 0x49b   : > { %1002 = vperm.xlu0 %1223, %v1242_v17  }
 0x49e   : > { %1016 = vperm.xlu1 %1224, %v992_v18  }
 0x49f   : > { %1021 = vperm.xlu0 %1223, %v997_v19  }
 0x519   : > { %v1008_v20 = vpop.permute.xlu1 %1007 }
 0x51a   : > { %v1003_v21 = vpop.permute.xlu0 %1002  ;;  %v1012_v24 = vmul.f32 %v1008_v20, %v1419_v37  ;;  %v1013_v25 = vmul.f32 %v1008_v20, %v1421_v38 }
 0x51b   : > { %v1010_v22 = vmul.f32 %v1003_v21, %v1415_v31  ;;  %v1011_v23 = vmul.f32 %v1003_v21, %v1417_v32  ;;  %1038 = sbr.rel (!%p1381_p5) target bundleno = 1322 (0x52a), region = 107 }
 0x51d   : > { %v1017_v26 = vpop.permute.xlu1 %1016 }
 0x51e   : > { %v1024_v27 = vadd.f32 %v1017_v26, %v1010_v22  ;;  %v1025_v28 = vadd.f32 %v1017_v26, %v1011_v23  ;;  %v1022_v29 = vpop.permute.xlu0 %1021 }
 0x51f   : > { %v1026_v30 = vadd.f32 %v1022_v29, %v1012_v24  ;;  %v1027_v33 = vadd.f32 %v1022_v29, %v1013_v25 }
 0x520   : > { %1028 = vst [vmem:[%s516_s19] sm:$0xff] %v1024_v27  ;;  %1029 = vst [vmem:[%s516_s19 + $0x8] sm:$0xff] %v1025_v28 }
 0x521   : > { %1030 = vst [vmem:[%s516_s19 + $0x10] sm:$0xff] %v1026_v30  ;;  %1031 = vst [vmem:[%s516_s19 + $0x18] sm:$0xff] %v1027_v33 }
 0x527   : > { %v1054_v31 = vld [vmem:[%s516_s19] sm:$0xff]  ;;  %v1056_v32 = vld [vmem:[%s516_s19 + $0x8] sm:$0xff] }
 0x528   : > { %v1058_v37 = vld [vmem:[%s516_s19 + $0x10] sm:$0xff]  ;;  %v1060_v38 = vld [vmem:[%s516_s19 + $0x18] sm:$0xff]  ;;  %1055 = vst [vmem:[%s1041_s29] sm:$0xff] %v1054_v31  ;;  %1057 = vst [vmem:[%s1041_s29 + $0x8] sm:$0xff] %v1056_v32 }
 0x529   : > { %1059 = vst [vmem:[%s1041_s29 + $0x20] sm:$0xff] %v1058_v37  ;;  %1061 = vst [vmem:[%s1041_s29 + $0x28] sm:$0xff] %v1060_v38 }
 0x52a PF: > { %p24_p10 = scmp.ge.s32.totalorder %s1368_s23, 4   ;;  %s1558_s20 = smov %s1261_s21 }
 0x52b   : > { %s1559_s21 = smov %s1379_s26  ;;  %s1560_s22 = smov %s1368_s23 }
 0x52c   :  { %26 = sbr.rel (!%p24_p10) target bundleno = 5 (0x5), region = 161 }

</bundles_post_ra>
